<compile_context>
chip_gen: v7x
topology: tpu7x:2x2x1
jax: 0.10.0
libtpu: 0.0.40
codegen_flags: <defaults>
</compile_context>

<pallas_src>
import math

import jax
import jax.numpy as jnp
from jax import lax
from jax.experimental import pallas as pl
from jax.experimental.pallas import tpu as pltpu
from jax.scipy.special import gammaln, digamma

EPS = 1e-6


# ----------------------------------------------------------------------------
# helpers
# ----------------------------------------------------------------------------
def _full_spec(shape):
    nd = len(shape)
    return pl.BlockSpec(shape, lambda i, _nd=nd: (0,) * _nd)


def _leaky_relu(x, slope=0.01):
    return jnp.maximum(x, slope * x)            # 2 VALU ops, no select


def _softplus(x):
    # stable softplus using only exp/log/abs/max (clean Mosaic lowering)
    return jnp.maximum(x, 0.0) + jnp.log(1.0 + jnp.exp(-jnp.abs(x)))


def _softclip(t, mn, mx):
    r = mn + _softplus(t - mn)
    r = mx - _softplus(mx - r)
    return r


def _flat(layers):
    out = []
    for W, b in layers:
        out += [W, b]
    return out


# ----------------------------------------------------------------------------
# fused forward kernel
# ----------------------------------------------------------------------------
def _make_fused_kernel(cfg, b_real):
    nx, nz, nw, K = cfg["nx"], cfg["nz"], cfg["nw"], cfg["nclasses"]
    numhidden = cfg["numhidden"]
    assert numhidden >= 1
    logk = math.log(float(K))
    half_log2pi = 0.5 * math.log(2.0 * math.pi)

    def kernel(*refs):
        (x_ref, noise_w_ref, noise_z_ref, lsig_ref, seg_ref, tile_ref) = refs[:6]
        (wz_out, w_out, z_out, qy_out, dlog_out,
         rec_out, zw_out, stats_out) = refs[-8:]
        p = 6

        def dot(a, b):
            return jnp.dot(a, b, preferred_element_type=jnp.float32)

        def mlp(h, p):
            # buildNetworkv5 (eval): [Dropout=id -> Linear(+folded BN) -> LeakyReLU] x H + Linear
            for _ in range(numhidden):
                W = refs[p][...]; b = refs[p + 1][...]; p += 2
                h = _leaky_relu(dot(h, W) + b)
            W = refs[p][...]; b = refs[p + 1][...]; p += 2
            return dot(h, W) + b, p

        def split_mlp(a, b, p):
            # first layer split by input: cat([a, b], 1) realised as two matmuls
            Wa = refs[p][...]; Wb = refs[p + 1][...]; bias = refs[p + 2][...]; p += 3
            h = _leaky_relu(dot(a, Wa) + dot(b, Wb) + bias)
            for _ in range(numhidden - 1):
                W = refs[p][...]; bias = refs[p + 1][...]; p += 2
                h = _leaky_relu(dot(h, W) + bias)
            W = refs[p][...]; bias = refs[p + 1][...]; p += 2
            return dot(h, W) + bias, p

        x = x_ref[...]                                   # (Bp, nx)
        Bp = x.shape[0]

        # ---------------- Qwz + reparameterization ----------------
        wz, p = mlp(x, p)                                # (Bp, 2*(nw+nz))
        D = nw + nz
        mu_w = wz[:, 0:nw]
        mu_z = wz[:, nw:D]
        logvar_w = wz[:, D:D + nw]
        logvar_z = wz[:, D + nw:2 * D]
        w = mu_w + noise_w_ref[...] * jnp.exp(0.5 * logvar_w)
        z = mu_z + noise_z_ref[...] * jnp.exp(0.5 * logvar_z)

        # -------- merged Qy/Qd (block-diag): one chain serves both heads --------
        yd, p = split_mlp(w, z, p)                       # (Bp, 2K)
        q_logits = yd[:, :K]
        d_logits = yd[:, K:]
        m = jnp.max(q_logits, axis=-1, keepdims=True)
        e = jnp.exp(q_logits - m)
        q_y = e / jnp.sum(e, axis=-1, keepdims=True)
        q_y = EPS / K + (1.0 - EPS) * q_y                # eps-mixed (as in reference)

        # -------- merged Pz/Px (block-diag): Pz(w) columns first, Px(z) second --------
        zwrec, p = split_mlp(w, z, p)                    # (Bp, 2*K*nz + nx)
        z_w = zwrec[:, :2 * K * nz]                      # [mu-block | logvar-block]
        rec = zwrec[:, 2 * K * nz:]                      # (Bp, nx)
        mu_zw = z_w[:, :K * nz]
        lv_zw = z_w[:, K * nz:]

        # ---------------- losses (reduced in-kernel) ----------------
        ls = _softclip(lsig_ref[...], -8.0, 8.0)         # (1, nx)
        diff = (x - rec) * jnp.exp(-ls)
        nll = 0.5 * diff * diff + ls + half_log2pi
        rec_per = jnp.sum(nll, axis=-1, keepdims=True)   # (Bp, 1)

        klw = -0.5 * (1.0 + logvar_w - mu_w * mu_w - jnp.exp(logvar_w))
        klw_per = jnp.sum(klw, axis=-1, keepdims=True)   # (Bp, 1)

        # lane-dense kld2normal over (Bp, K*nz): tiling + per-class q_y weighting via MXU
        mu_z_t = dot(mu_z, tile_ref[...])                # exact copy-tile of mu_z per class
        lv_z_t = dot(logvar_z, tile_ref[...])
        kld = 0.5 * (-1.0 + (lv_zw - lv_z_t) + jnp.exp(lv_z_t - lv_zw)
                     + (mu_zw - mu_z_t) ** 2 * jnp.exp(-lv_zw))
        q_rep = dot(q_y, seg_ref[...])                   # q_y[b,k] repeated nz times
        klz_per = jnp.sum(q_rep * kld, axis=-1, keepdims=True)

        log_q = jnp.log(q_y)
        qlogq_per = jnp.sum(q_y * log_q, axis=-1, keepdims=True)
        lalt_per = jnp.sum(q_y * (log_q + logk), axis=-1, keepdims=True)
        qmax_per = jnp.max(q_y, axis=-1, keepdims=True)

        row = lax.broadcasted_iota(jnp.int32, (Bp, 1), 0)
        bmask = (row < b_real).astype(jnp.float32)       # mask out batch padding
        inv_b = 1.0 / float(b_real)

        def bmean(v):                                    # (Bp,1) -> (1,1) over real rows
            return jnp.sum(v * bmask, axis=0, keepdims=True) * inv_b

        loss_rec_m = bmean(rec_per)
        klw_m = bmean(klw_per)
        klz_m = bmean(klz_per)
        lalt_m = bmean(lalt_per)
        lossy_m = -bmean(qmax_per)
        qlogq_m = bmean(qlogq_per)
        qym = jnp.sum(q_y * bmask, axis=0, keepdims=True) * inv_b     # (1, K)
        lossl_m = jnp.sum(qym * (jnp.log(qym) + logk), axis=-1, keepdims=True)

        # pack scalar stats into one lane-dense (1, 128) row
        lane = lax.broadcasted_iota(jnp.int32, (1, 128), 1)
        stats = jnp.zeros((1, 128), jnp.float32)
        for i, v in enumerate((loss_rec_m, klw_m, klz_m, lossl_m,
                               lalt_m, lossy_m, qlogq_m)):
            stats = jnp.where(lane == i, v, stats)

        # ---------------- stores ----------------
        wz_out[...] = wz
        w_out[...] = w
        z_out[...] = z
        qy_out[...] = q_y
        dlog_out[...] = d_logits
        rec_out[...] = rec
        zw_out[...] = z_w
        stats_out[...] = stats

    return kernel


# ----------------------------------------------------------------------------
# parameter construction (deterministic, PyTorch-like init, BN folded on host)
# ----------------------------------------------------------------------------
def init_linear(key, d_in, d_out):
    kw, kb = jax.random.split(key)
    lim = 1.0 / math.sqrt(d_in)
    W = jax.random.uniform(kw, (d_in, d_out), jnp.float32, -lim, lim)
    b = jax.random.uniform(kb, (1, d_out), jnp.float32, -lim, lim)
    return W, b


def fold_bn(W, b, gamma, beta, running_mean, running_var, eps=1e-5):
    # eval-mode BatchNorm1d folded into the preceding Linear
    scale = gamma / jnp.sqrt(running_var + eps)
    return W * scale[None, :], (b - running_mean[None, :]) * scale[None, :] + beta[None, :]


def init_mlp(key, dims, batchnorm=True):
    layers = []
    keys = jax.random.split(key, len(dims) - 1)
    for i in range(1, len(dims) - 1):
        W, b = init_linear(keys[i - 1], dims[i - 1], dims[i])
        if batchnorm:   # fresh BN: gamma=1, beta=0, mean=0, var=1
            d = dims[i]
            W, b = fold_bn(W, b, jnp.ones(d, jnp.float32), jnp.zeros(d, jnp.float32),
                           jnp.zeros(d, jnp.float32), jnp.ones(d, jnp.float32))
        layers.append((W, b))
    W, b = init_linear(keys[-1], dims[-2], dims[-1])
    layers.append((W, b))
    return layers


def _blockdiag(la, lb):
    """Block-diagonal merge of the hidden/final layers of two same-depth MLPs (exact)."""
    out = []
    for (Wa, ba), (Wb, bb) in zip(la, lb):
        zt = jnp.zeros((Wa.shape[0], Wb.shape[1]), jnp.float32)
        zb = jnp.zeros((Wb.shape[0], Wa.shape[1]), jnp.float32)
        W = jnp.concatenate([jnp.concatenate([Wa, zt], axis=1),
                             jnp.concatenate([zb, Wb], axis=1)], axis=0)
        out.append((W, jnp.concatenate([ba, bb], axis=1)))
    return out


def merge_qy_qd(qy_layers, qd_layers, nw):
    """Merge Qy and Qd (identical dims, identical cat([w,z],1) input) into one
    block-diagonal MLP; the first layer is split by input rows (w | z)."""
    (Wy1, by1), (Wd1, bd1) = qy_layers[0], qd_layers[0]
    W1 = jnp.concatenate([Wy1, Wd1], axis=1)            # (nw+nz, 2*nh)
    b1 = jnp.concatenate([by1, bd1], axis=1)
    return dict(Wa=W1[:nw, :], Wb=W1[nw:, :], b1=b1,    # Wa acts on w, Wb on z
                rest=_blockdiag(qy_layers[1:], qd_layers[1:]))


def merge_pz_px(pz_layers, px_layers):
    """Merge Pz (input w) and Px (input z) into one block-diagonal MLP; the first
    layer takes (w, z) via two zero-padded matmuls.  Output columns = [z_w | rec]."""
    (Wz1, bz1), (Wx1, bx1) = pz_layers[0], px_layers[0]
    nh_z, nh_x = Wz1.shape[1], Wx1.shape[1]
    Wa = jnp.concatenate([Wz1, jnp.zeros((Wz1.shape[0], nh_x), jnp.float32)], axis=1)  # acts on w
    Wb = jnp.concatenate([jnp.zeros((Wx1.shape[0], nh_z), jnp.float32), Wx1], axis=1)  # acts on z
    b1 = jnp.concatenate([bz1, bx1], axis=1)
    return dict(Wa=Wa, Wb=Wb, b1=b1, rest=_blockdiag(pz_layers[1:], px_layers[1:]))


def permute_pz_final(layers, K, nz):
    """Permute Pz final-layer columns from interleaved [mu_k | lv_k]*K to [all mu | all lv]."""
    W, b = layers[-1]
    idx_mu = (jnp.arange(K)[:, None] * (2 * nz) + jnp.arange(nz)[None, :]).reshape(-1)
    perm = jnp.concatenate([idx_mu, idx_mu + nz])
    return layers[:-1] + [(W[:, perm], b[:, perm])]


def init_params(key, cfg):
    nx, nh, nz, nw, K, nhid = (cfg["nx"], cfg["nh"], cfg["nz"], cfg["nw"],
                               cfg["nclasses"], cfg["numhidden"])
    kp = jax.random.split(key, 5)
    Px = init_mlp(kp[0], [nz] + nhid * [nh] + [nx])
    Pz = permute_pz_final(init_mlp(kp[1], [nw] + nhid * [nh] + [2 * K * nz]), K, nz)
    Qwz = init_mlp(kp[2], [nx] + nhid * [nh] + [2 * nw + 2 * nz])
    Qy = init_mlp(kp[3], [nw + nz] + nhid * [nh] + [K])
    Qd = init_mlp(kp[4], [nw + nz] + nhid * [nh] + [K])
    Qyd = merge_qy_qd(Qy, Qd, nw)
    PzPx = merge_pz_px(Pz, Px)
    seg = jnp.repeat(jnp.eye(K, dtype=jnp.float32), nz, axis=1)        # (K, K*nz)
    tile = jnp.tile(jnp.eye(nz, dtype=jnp.float32), (1, K))            # (nz, K*nz)
    return dict(Qwz=Qwz, Qyd=Qyd, PzPx=PzPx,
                logsigma_x=jnp.zeros((nx,), jnp.float32), seg=seg, tile=tile)


# ----------------------------------------------------------------------------
# forward pass (y=None branch, reclosstype='Gauss', applytanh=False)
# ----------------------------------------------------------------------------
def vae_dirichlet_forward(params, x_img, key, cfg):
    nx, nz, nw, K = cfg["nx"], cfg["nz"], cfg["nw"], cfg["nclasses"]
    dscale, wscale = cfg["dscale"], cfg["wscale"]
    yscale, zscale = cfg["yscale"], cfg["zscale"]
    concentration = cfg["concentration"]
    B = x_img.shape[0]
    x = x_img.reshape(B, -1)                            # nn.Flatten (NCHW row-major)

    B_pad = max(8, ((B + 7) // 8) * 8)                  # f32 sublane multiple
    pad = B_pad - B
    k_w, k_z, k_d = jax.random.split(key, 3)
    x_p = jnp.pad(x, ((0, pad), (0, 0)))
    noise_w = jnp.pad(jax.random.normal(k_w, (B, nw), jnp.float32), ((0, pad), (0, 0)))
    noise_z = jnp.pad(jax.random.normal(k_z, (B, nz), jnp.float32), ((0, pad), (0, 0)))
    lsig = params["logsigma_x"].reshape(1, nx)

    args = ([x_p, noise_w, noise_z, lsig, params["seg"], params["tile"]]
            + _flat(params["Qwz"])
            + [params["Qyd"]["Wa"], params["Qyd"]["Wb"], params["Qyd"]["b1"]]
            + _flat(params["Qyd"]["rest"])
            + [params["PzPx"]["Wa"], params["PzPx"]["Wb"], params["PzPx"]["b1"]]
            + _flat(params["PzPx"]["rest"]))

    f32 = jnp.float32
    out_shape = (
        jax.ShapeDtypeStruct((B_pad, 2 * (nw + nz)), f32),   # wz (flat)
        jax.ShapeDtypeStruct((B_pad, nw), f32),              # w
        jax.ShapeDtypeStruct((B_pad, nz), f32),              # z
        jax.ShapeDtypeStruct((B_pad, K), f32),               # q_y
        jax.ShapeDtypeStruct((B_pad, K), f32),               # d_logits
        jax.ShapeDtypeStruct((B_pad, nx), f32),              # rec
        jax.ShapeDtypeStruct((B_pad, 2 * K * nz), f32),      # z_w ([mu | logvar])
        jax.ShapeDtypeStruct((1, 128), f32),                 # lane-dense scalar stats
    )
    # TODO(synk): when B grows, put the batch on a real grid axis marked "parallel"
    # (v7x 2-TC sharding) and re-derive the batch tile for v7x's 64 MiB VMEM.
    outs = pl.pallas_call(
        _make_fused_kernel(cfg, B),
        grid=(1,),
        in_specs=[_full_spec(a.shape) for a in args],
        out_specs=tuple(_full_spec(s.shape) for s in out_shape),
        out_shape=out_shape,
        compiler_params=pltpu.CompilerParams(dimension_semantics=("arbitrary",)),
    )(*args)

    (wz_f, w_p, z_p, qy_p, dlog_p, rec_p, zw_f, stats) = outs
    wz = wz_f[:B].reshape(B, 2, nw + nz)
    mu_w, logvar_w = wz[:, 0, :nw], wz[:, 1, :nw]
    mu_z, logvar_z = wz[:, 0, nw:], wz[:, 1, nw:]
    w, z = w_p[:B], z_p[:B]
    q_y, d_logits, rec = qy_p[:B], dlog_p[:B], rec_p[:B]
    mu_z_w = zw_f[:B, :K * nz].reshape(B, K, nz)
    logvar_z_w = zw_f[:B, K * nz:].reshape(B, K, nz)

    s = stats[0]
    loss_rec = s[0]
    loss_w = wscale * s[1]
    loss_z = zscale * s[2]          # (q_y * kld2normal(...).sum(-1)).sum(-1).mean()
    loss_l = s[3]
    loss_l_alt = s[4]
    loss_y = s[5]
    qlogq_mean = s[6]               # mean_b sum_k q_y log q_y

    # ---- Dirichlet branch: sampling + gammaln/digamma stay in XLA ----
    alpha = jnp.exp(d_logits)       # NOTE: unclamped, matches the PyTorch reference
    p_y = jax.random.dirichlet(k_d, alpha)
    p_y = EPS / K + (1.0 - EPS) * p_y
    loss_y_alt = yscale * (qlogq_mean - jnp.mean(jnp.sum(q_y * jnp.log(p_y), axis=-1)))
    loss_y_alt2 = jnp.float32(0.0)

    beta = jnp.full((K,), concentration, jnp.float32)
    kl_dir = (gammaln(jnp.sum(alpha, -1)) - jnp.sum(gammaln(alpha), -1)
              - gammaln(jnp.sum(beta)) + jnp.sum(gammaln(beta))
              + jnp.sum((alpha - beta)
                        * (digamma(alpha) - digamma(jnp.sum(alpha, -1, keepdims=True))),
                        axis=-1))
    loss_d = dscale * jnp.mean(kl_dir)

    total_loss = loss_rec + loss_z + loss_w + loss_d + loss_y_alt + loss_y_alt2
    num_clusters = jnp.sum(jnp.sum(jnp.where(q_y > 0.5, q_y, 0.0), axis=0) > 0)

    losses = dict(rec=loss_rec, loss_z=loss_z, loss_w=loss_w, loss_l=loss_l,
                  loss_l_alt=loss_l_alt, loss_y=loss_y, loss_d=loss_d,
                  loss_y_alt=loss_y_alt, loss_y_alt2=loss_y_alt2,
                  total_loss=total_loss, num_clusters=num_clusters)
    output = dict(wz=wz, mu_z=mu_z, mu_w=mu_w, logvar_z=logvar_z, logvar_w=logvar_w,
                  d_logits=d_logits, q_y=q_y, w=w, z=z, rec=rec,
                  mu_z_w=mu_z_w, logvar_z_w=logvar_z_w, p_y=p_y, losses=losses)
    # TODO(synk): torch.distributions objects (Pz, Py, Qy, D_y) are returned only via
    # their defining parameters; distribution objects have no array equivalent.
    return output


# ----------------------------------------------------------------------------
if __name__ == "__main__":
    cfg = dict(nx=64, nh=32, nz=16, nw=8, nclasses=10,
               dscale=1.0, wscale=1.0, yscale=1.0, zscale=1.0,
               concentration=0.5, numhidden=2)

    key = jax.random.PRNGKey(0)
    k_params, k_data, k_noise = jax.random.split(key, 3)
    params = init_params(k_params, cfg)

    # input layout: NCHW (B=2, C=1, H=8, W=8) -> flattened nx = 64
    x_img = jax.random.uniform(k_data, (2, 1, 8, 8), jnp.float32)

    fwd = jax.jit(lambda p, xi, k: vae_dirichlet_forward(p, xi, k, cfg))
    out = fwd(params, x_img, k_noise)
    jax.block_until_ready(out["losses"]["total_loss"])
    print("KERNEL_OK")
</pallas_src>

<mosaic_0001>
module attributes {stable_mosaic.version = 11 : i64} {
  func.func @kernel(%arg0: i32, %arg1: memref<8x64xf32, #tpu.memory_space<vmem>>, %arg2: memref<8x8xf32, #tpu.memory_space<vmem>>, %arg3: memref<8x16xf32, #tpu.memory_space<vmem>>, %arg4: memref<1x64xf32, #tpu.memory_space<vmem>>, %arg5: memref<10x160xf32, #tpu.memory_space<vmem>>, %arg6: memref<16x160xf32, #tpu.memory_space<vmem>>, %arg7: memref<64x32xf32, #tpu.memory_space<vmem>>, %arg8: memref<1x32xf32, #tpu.memory_space<vmem>>, %arg9: memref<32x32xf32, #tpu.memory_space<vmem>>, %arg10: memref<1x32xf32, #tpu.memory_space<vmem>>, %arg11: memref<32x48xf32, #tpu.memory_space<vmem>>, %arg12: memref<1x48xf32, #tpu.memory_space<vmem>>, %arg13: memref<8x64xf32, #tpu.memory_space<vmem>>, %arg14: memref<16x64xf32, #tpu.memory_space<vmem>>, %arg15: memref<1x64xf32, #tpu.memory_space<vmem>>, %arg16: memref<64x64xf32, #tpu.memory_space<vmem>>, %arg17: memref<1x64xf32, #tpu.memory_space<vmem>>, %arg18: memref<64x20xf32, #tpu.memory_space<vmem>>, %arg19: memref<1x20xf32, #tpu.memory_space<vmem>>, %arg20: memref<8x64xf32, #tpu.memory_space<vmem>>, %arg21: memref<16x64xf32, #tpu.memory_space<vmem>>, %arg22: memref<1x64xf32, #tpu.memory_space<vmem>>, %arg23: memref<64x64xf32, #tpu.memory_space<vmem>>, %arg24: memref<1x64xf32, #tpu.memory_space<vmem>>, %arg25: memref<64x384xf32, #tpu.memory_space<vmem>>, %arg26: memref<1x384xf32, #tpu.memory_space<vmem>>, %arg27: memref<8x48xf32, #tpu.memory_space<vmem>>, %arg28: memref<8x8xf32, #tpu.memory_space<vmem>>, %arg29: memref<8x16xf32, #tpu.memory_space<vmem>>, %arg30: memref<8x10xf32, #tpu.memory_space<vmem>>, %arg31: memref<8x10xf32, #tpu.memory_space<vmem>>, %arg32: memref<8x64xf32, #tpu.memory_space<vmem>>, %arg33: memref<8x320xf32, #tpu.memory_space<vmem>>, %arg34: memref<1x128xf32, #tpu.memory_space<vmem>>) attributes {dimension_semantics = [#tpu.dimension_semantics<arbitrary>], iteration_bounds = array<i64: 1>, scalar_prefetch = 0 : i64, scratch_operands = 0 : i64, tpu.core_type = #tpu.core_type<tc>, window_params = [{pipeline_mode = #tpu.pipeline_mode<synchronous>, transform_indices = @transform_0, window_bounds = array<i64: 8, 64>}, {pipeline_mode = #tpu.pipeline_mode<synchronous>, transform_indices = @transform_1, window_bounds = array<i64: 8, 8>}, {pipeline_mode = #tpu.pipeline_mode<synchronous>, transform_indices = @transform_2, window_bounds = array<i64: 8, 16>}, {pipeline_mode = #tpu.pipeline_mode<synchronous>, transform_indices = @transform_3, window_bounds = array<i64: 1, 64>}, {pipeline_mode = #tpu.pipeline_mode<synchronous>, transform_indices = @transform_4, window_bounds = array<i64: 10, 160>}, {pipeline_mode = #tpu.pipeline_mode<synchronous>, transform_indices = @transform_5, window_bounds = array<i64: 16, 160>}, {pipeline_mode = #tpu.pipeline_mode<synchronous>, transform_indices = @transform_6, window_bounds = array<i64: 64, 32>}, {pipeline_mode = #tpu.pipeline_mode<synchronous>, transform_indices = @transform_7, window_bounds = array<i64: 1, 32>}, {pipeline_mode = #tpu.pipeline_mode<synchronous>, transform_indices = @transform_8, window_bounds = array<i64: 32, 32>}, {pipeline_mode = #tpu.pipeline_mode<synchronous>, transform_indices = @transform_9, window_bounds = array<i64: 1, 32>}, {pipeline_mode = #tpu.pipeline_mode<synchronous>, transform_indices = @transform_10, window_bounds = array<i64: 32, 48>}, {pipeline_mode = #tpu.pipeline_mode<synchronous>, transform_indices = @transform_11, window_bounds = array<i64: 1, 48>}, {pipeline_mode = #tpu.pipeline_mode<synchronous>, transform_indices = @transform_12, window_bounds = array<i64: 8, 64>}, {pipeline_mode = #tpu.pipeline_mode<synchronous>, transform_indices = @transform_13, window_bounds = array<i64: 16, 64>}, {pipeline_mode = #tpu.pipeline_mode<synchronous>, transform_indices = @transform_14, window_bounds = array<i64: 1, 64>}, {pipeline_mode = #tpu.pipeline_mode<synchronous>, transform_indices = @transform_15, window_bounds = array<i64: 64, 64>}, {pipeline_mode = #tpu.pipeline_mode<synchronous>, transform_indices = @transform_16, window_bounds = array<i64: 1, 64>}, {pipeline_mode = #tpu.pipeline_mode<synchronous>, transform_indices = @transform_17, window_bounds = array<i64: 64, 20>}, {pipeline_mode = #tpu.pipeline_mode<synchronous>, transform_indices = @transform_18, window_bounds = array<i64: 1, 20>}, {pipeline_mode = #tpu.pipeline_mode<synchronous>, transform_indices = @transform_19, window_bounds = array<i64: 8, 64>}, {pipeline_mode = #tpu.pipeline_mode<synchronous>, transform_indices = @transform_20, window_bounds = array<i64: 16, 64>}, {pipeline_mode = #tpu.pipeline_mode<synchronous>, transform_indices = @transform_21, window_bounds = array<i64: 1, 64>}, {pipeline_mode = #tpu.pipeline_mode<synchronous>, transform_indices = @transform_22, window_bounds = array<i64: 64, 64>}, {pipeline_mode = #tpu.pipeline_mode<synchronous>, transform_indices = @transform_23, window_bounds = array<i64: 1, 64>}, {pipeline_mode = #tpu.pipeline_mode<synchronous>, transform_indices = @transform_24, window_bounds = array<i64: 64, 384>}, {pipeline_mode = #tpu.pipeline_mode<synchronous>, transform_indices = @transform_25, window_bounds = array<i64: 1, 384>}, {pipeline_mode = #tpu.pipeline_mode<synchronous>, transform_indices = @transform_26, window_bounds = array<i64: 8, 48>}, {pipeline_mode = #tpu.pipeline_mode<synchronous>, transform_indices = @transform_27, window_bounds = array<i64: 8, 8>}, {pipeline_mode = #tpu.pipeline_mode<synchronous>, transform_indices = @transform_28, window_bounds = array<i64: 8, 16>}, {pipeline_mode = #tpu.pipeline_mode<synchronous>, transform_indices = @transform_29, window_bounds = array<i64: 8, 10>}, {pipeline_mode = #tpu.pipeline_mode<synchronous>, transform_indices = @transform_30, window_bounds = array<i64: 8, 10>}, {pipeline_mode = #tpu.pipeline_mode<synchronous>, transform_indices = @transform_31, window_bounds = array<i64: 8, 64>}, {pipeline_mode = #tpu.pipeline_mode<synchronous>, transform_indices = @transform_32, window_bounds = array<i64: 8, 320>}, {pipeline_mode = #tpu.pipeline_mode<synchronous>, transform_indices = @transform_33, window_bounds = array<i64: 1, 128>}]} {
    %c0 = arith.constant 0 : index
    %c0_0 = arith.constant 0 : index
    %0 = vector.load %arg1[%c0, %c0_0] : memref<8x64xf32, #tpu.memory_space<vmem>>, vector<8x64xf32>
    %c0_1 = arith.constant 0 : index
    %c0_2 = arith.constant 0 : index
    %1 = vector.load %arg7[%c0_1, %c0_2] : memref<64x32xf32, #tpu.memory_space<vmem>>, vector<64x32xf32>
    %c0_3 = arith.constant 0 : index
    %c0_4 = arith.constant 0 : index
    %2 = vector.load %arg8[%c0_3, %c0_4] : memref<1x32xf32, #tpu.memory_space<vmem>>, vector<1x32xf32>
    %cst = arith.constant dense<0.000000e+00> : vector<8x32xf32>
    %3 = tpu.matmul %0, %1, %cst {dimension_numbers = #tpu.dot_dimension_numbers<[1], [0], [0], [1], [0, 0, 1, 1], [], []>} : vector<8x64xf32>, vector<64x32xf32>, vector<8x32xf32> -> vector<8x32xf32>
    %4 = vector.broadcast %2 : vector<1x32xf32> to vector<8x32xf32>
    %5 = arith.addf %3, %4 : vector<8x32xf32>
    %cst_5 = arith.constant 0.00999999977 : f32
    %6 = vector.broadcast %cst_5 : f32 to vector<8x32xf32>
    %7 = arith.mulf %6, %5 : vector<8x32xf32>
    %8 = arith.maximumf %5, %7 : vector<8x32xf32>
    %c0_6 = arith.constant 0 : index
    %c0_7 = arith.constant 0 : index
    %9 = vector.load %arg9[%c0_6, %c0_7] : memref<32x32xf32, #tpu.memory_space<vmem>>, vector<32x32xf32>
    %c0_8 = arith.constant 0 : index
    %c0_9 = arith.constant 0 : index
    %10 = vector.load %arg10[%c0_8, %c0_9] : memref<1x32xf32, #tpu.memory_space<vmem>>, vector<1x32xf32>
    %cst_10 = arith.constant dense<0.000000e+00> : vector<8x32xf32>
    %11 = tpu.matmul %8, %9, %cst_10 {dimension_numbers = #tpu.dot_dimension_numbers<[1], [0], [0], [1], [0, 0, 1, 1], [], []>} : vector<8x32xf32>, vector<32x32xf32>, vector<8x32xf32> -> vector<8x32xf32>
    %12 = vector.broadcast %10 : vector<1x32xf32> to vector<8x32xf32>
    %13 = arith.addf %11, %12 : vector<8x32xf32>
    %cst_11 = arith.constant 0.00999999977 : f32
    %14 = vector.broadcast %cst_11 : f32 to vector<8x32xf32>
    %15 = arith.mulf %14, %13 : vector<8x32xf32>
    %16 = arith.maximumf %13, %15 : vector<8x32xf32>
    %c0_12 = arith.constant 0 : index
    %c0_13 = arith.constant 0 : index
    %17 = vector.load %arg11[%c0_12, %c0_13] : memref<32x48xf32, #tpu.memory_space<vmem>>, vector<32x48xf32>
    %c0_14 = arith.constant 0 : index
    %c0_15 = arith.constant 0 : index
    %18 = vector.load %arg12[%c0_14, %c0_15] : memref<1x48xf32, #tpu.memory_space<vmem>>, vector<1x48xf32>
    %cst_16 = arith.constant dense<0.000000e+00> : vector<8x48xf32>
    %19 = tpu.matmul %16, %17, %cst_16 {dimension_numbers = #tpu.dot_dimension_numbers<[1], [0], [0], [1], [0, 0, 1, 1], [], []>} : vector<8x32xf32>, vector<32x48xf32>, vector<8x48xf32> -> vector<8x48xf32>
    %20 = vector.broadcast %18 : vector<1x48xf32> to vector<8x48xf32>
    %21 = arith.addf %19, %20 : vector<8x48xf32>
    %22 = vector.extract_strided_slice %21 {offsets = [0, 0], sizes = [8, 8], strides = [1, 1]} : vector<8x48xf32> to vector<8x8xf32>
    %23 = vector.extract_strided_slice %21 {offsets = [0, 8], sizes = [8, 16], strides = [1, 1]} : vector<8x48xf32> to vector<8x16xf32>
    %24 = vector.extract_strided_slice %21 {offsets = [0, 24], sizes = [8, 8], strides = [1, 1]} : vector<8x48xf32> to vector<8x8xf32>
    %25 = vector.extract_strided_slice %21 {offsets = [0, 32], sizes = [8, 16], strides = [1, 1]} : vector<8x48xf32> to vector<8x16xf32>
    %c0_17 = arith.constant 0 : index
    %c0_18 = arith.constant 0 : index
    %26 = vector.load %arg2[%c0_17, %c0_18] : memref<8x8xf32, #tpu.memory_space<vmem>>, vector<8x8xf32>
    %cst_19 = arith.constant 5.000000e-01 : f32
    %27 = vector.broadcast %cst_19 : f32 to vector<8x8xf32>
    %28 = arith.mulf %27, %24 : vector<8x8xf32>
    %29 = math.exp %28 : vector<8x8xf32>
    %30 = arith.mulf %26, %29 : vector<8x8xf32>
    %31 = arith.addf %22, %30 : vector<8x8xf32>
    %c0_20 = arith.constant 0 : index
    %c0_21 = arith.constant 0 : index
    %32 = vector.load %arg3[%c0_20, %c0_21] : memref<8x16xf32, #tpu.memory_space<vmem>>, vector<8x16xf32>
    %cst_22 = arith.constant 5.000000e-01 : f32
    %33 = vector.broadcast %cst_22 : f32 to vector<8x16xf32>
    %34 = arith.mulf %33, %25 : vector<8x16xf32>
    %35 = math.exp %34 : vector<8x16xf32>
    %36 = arith.mulf %32, %35 : vector<8x16xf32>
    %37 = arith.addf %23, %36 : vector<8x16xf32>
    %c0_23 = arith.constant 0 : index
    %c0_24 = arith.constant 0 : index
    %38 = vector.load %arg13[%c0_23, %c0_24] : memref<8x64xf32, #tpu.memory_space<vmem>>, vector<8x64xf32>
    %c0_25 = arith.constant 0 : index
    %c0_26 = arith.constant 0 : index
    %39 = vector.load %arg14[%c0_25, %c0_26] : memref<16x64xf32, #tpu.memory_space<vmem>>, vector<16x64xf32>
    %c0_27 = arith.constant 0 : index
    %c0_28 = arith.constant 0 : index
    %40 = vector.load %arg15[%c0_27, %c0_28] : memref<1x64xf32, #tpu.memory_space<vmem>>, vector<1x64xf32>
    %cst_29 = arith.constant dense<0.000000e+00> : vector<8x64xf32>
    %41 = tpu.matmul %31, %38, %cst_29 {dimension_numbers = #tpu.dot_dimension_numbers<[1], [0], [0], [1], [0, 0, 1, 1], [], []>} : vector<8x8xf32>, vector<8x64xf32>, vector<8x64xf32> -> vector<8x64xf32>
    %cst_30 = arith.constant dense<0.000000e+00> : vector<8x64xf32>
    %42 = tpu.matmul %37, %39, %cst_30 {dimension_numbers = #tpu.dot_dimension_numbers<[1], [0], [0], [1], [0, 0, 1, 1], [], []>} : vector<8x16xf32>, vector<16x64xf32>, vector<8x64xf32> -> vector<8x64xf32>
    %43 = arith.addf %41, %42 : vector<8x64xf32>
    %44 = vector.broadcast %40 : vector<1x64xf32> to vector<8x64xf32>
    %45 = arith.addf %43, %44 : vector<8x64xf32>
    %cst_31 = arith.constant 0.00999999977 : f32
    %46 = vector.broadcast %cst_31 : f32 to vector<8x64xf32>
    %47 = arith.mulf %46, %45 : vector<8x64xf32>
    %48 = arith.maximumf %45, %47 : vector<8x64xf32>
    %c0_32 = arith.constant 0 : index
    %c0_33 = arith.constant 0 : index
    %49 = vector.load %arg16[%c0_32, %c0_33] : memref<64x64xf32, #tpu.memory_space<vmem>>, vector<64x64xf32>
    %c0_34 = arith.constant 0 : index
    %c0_35 = arith.constant 0 : index
    %50 = vector.load %arg17[%c0_34, %c0_35] : memref<1x64xf32, #tpu.memory_space<vmem>>, vector<1x64xf32>
    %cst_36 = arith.constant dense<0.000000e+00> : vector<8x64xf32>
    %51 = tpu.matmul %48, %49, %cst_36 {dimension_numbers = #tpu.dot_dimension_numbers<[1], [0], [0], [1], [0, 0, 1, 1], [], []>} : vector<8x64xf32>, vector<64x64xf32>, vector<8x64xf32> -> vector<8x64xf32>
    %52 = vector.broadcast %50 : vector<1x64xf32> to vector<8x64xf32>
    %53 = arith.addf %51, %52 : vector<8x64xf32>
    %cst_37 = arith.constant 0.00999999977 : f32
    %54 = vector.broadcast %cst_37 : f32 to vector<8x64xf32>
    %55 = arith.mulf %54, %53 : vector<8x64xf32>
    %56 = arith.maximumf %53, %55 : vector<8x64xf32>
    %c0_38 = arith.constant 0 : index
    %c0_39 = arith.constant 0 : index
    %57 = vector.load %arg18[%c0_38, %c0_39] : memref<64x20xf32, #tpu.memory_space<vmem>>, vector<64x20xf32>
    %c0_40 = arith.constant 0 : index
    %c0_41 = arith.constant 0 : index
    %58 = vector.load %arg19[%c0_40, %c0_41] : memref<1x20xf32, #tpu.memory_space<vmem>>, vector<1x20xf32>
    %cst_42 = arith.constant dense<0.000000e+00> : vector<8x20xf32>
    %59 = tpu.matmul %56, %57, %cst_42 {dimension_numbers = #tpu.dot_dimension_numbers<[1], [0], [0], [1], [0, 0, 1, 1], [], []>} : vector<8x64xf32>, vector<64x20xf32>, vector<8x20xf32> -> vector<8x20xf32>
    %60 = vector.broadcast %58 : vector<1x20xf32> to vector<8x20xf32>
    %61 = arith.addf %59, %60 : vector<8x20xf32>
    %62 = vector.extract_strided_slice %61 {offsets = [0, 0], sizes = [8, 10], strides = [1, 1]} : vector<8x20xf32> to vector<8x10xf32>
    %63 = vector.extract_strided_slice %61 {offsets = [0, 10], sizes = [8, 10], strides = [1, 1]} : vector<8x20xf32> to vector<8x10xf32>
    %cst_43 = arith.constant dense<0xFF800000> : vector<8xf32>
    %64 = vector.multi_reduction <maximumf>, %62, %cst_43 [1] : vector<8x10xf32> to vector<8xf32>
    %65 = vector.shape_cast %64 : vector<8xf32> to vector<8x1xf32>
    %66 = vector.broadcast %65 : vector<8x1xf32> to vector<8x10xf32>
    %67 = arith.subf %62, %66 : vector<8x10xf32>
    %68 = math.exp %67 : vector<8x10xf32>
    %cst_44 = arith.constant dense<0.000000e+00> : vector<8xf32>
    %69 = vector.multi_reduction <add>, %68, %cst_44 [1] : vector<8x10xf32> to vector<8xf32>
    %70 = vector.shape_cast %69 : vector<8xf32> to vector<8x1xf32>
    %71 = vector.broadcast %70 : vector<8x1xf32> to vector<8x10xf32>
    %72 = arith.divf %68, %71 : vector<8x10xf32>
    %cst_45 = arith.constant 0.999998986 : f32
    %73 = vector.broadcast %cst_45 : f32 to vector<8x10xf32>
    %74 = arith.mulf %73, %72 : vector<8x10xf32>
    %cst_46 = arith.constant 1.000000e-07 : f32
    %75 = vector.broadcast %cst_46 : f32 to vector<8x10xf32>
    %76 = arith.addf %75, %74 : vector<8x10xf32>
    %c0_47 = arith.constant 0 : index
    %c0_48 = arith.constant 0 : index
    %77 = vector.load %arg20[%c0_47, %c0_48] : memref<8x64xf32, #tpu.memory_space<vmem>>, vector<8x64xf32>
    %c0_49 = arith.constant 0 : index
    %c0_50 = arith.constant 0 : index
    %78 = vector.load %arg21[%c0_49, %c0_50] : memref<16x64xf32, #tpu.memory_space<vmem>>, vector<16x64xf32>
    %c0_51 = arith.constant 0 : index
    %c0_52 = arith.constant 0 : index
    %79 = vector.load %arg22[%c0_51, %c0_52] : memref<1x64xf32, #tpu.memory_space<vmem>>, vector<1x64xf32>
    %cst_53 = arith.constant dense<0.000000e+00> : vector<8x64xf32>
    %80 = tpu.matmul %31, %77, %cst_53 {dimension_numbers = #tpu.dot_dimension_numbers<[1], [0], [0], [1], [0, 0, 1, 1], [], []>} : vector<8x8xf32>, vector<8x64xf32>, vector<8x64xf32> -> vector<8x64xf32>
    %cst_54 = arith.constant dense<0.000000e+00> : vector<8x64xf32>
    %81 = tpu.matmul %37, %78, %cst_54 {dimension_numbers = #tpu.dot_dimension_numbers<[1], [0], [0], [1], [0, 0, 1, 1], [], []>} : vector<8x16xf32>, vector<16x64xf32>, vector<8x64xf32> -> vector<8x64xf32>
    %82 = arith.addf %80, %81 : vector<8x64xf32>
    %83 = vector.broadcast %79 : vector<1x64xf32> to vector<8x64xf32>
    %84 = arith.addf %82, %83 : vector<8x64xf32>
    %cst_55 = arith.constant 0.00999999977 : f32
    %85 = vector.broadcast %cst_55 : f32 to vector<8x64xf32>
    %86 = arith.mulf %85, %84 : vector<8x64xf32>
    %87 = arith.maximumf %84, %86 : vector<8x64xf32>
    %c0_56 = arith.constant 0 : index
    %c0_57 = arith.constant 0 : index
    %88 = vector.load %arg23[%c0_56, %c0_57] : memref<64x64xf32, #tpu.memory_space<vmem>>, vector<64x64xf32>
    %c0_58 = arith.constant 0 : index
    %c0_59 = arith.constant 0 : index
    %89 = vector.load %arg24[%c0_58, %c0_59] : memref<1x64xf32, #tpu.memory_space<vmem>>, vector<1x64xf32>
    %cst_60 = arith.constant dense<0.000000e+00> : vector<8x64xf32>
    %90 = tpu.matmul %87, %88, %cst_60 {dimension_numbers = #tpu.dot_dimension_numbers<[1], [0], [0], [1], [0, 0, 1, 1], [], []>} : vector<8x64xf32>, vector<64x64xf32>, vector<8x64xf32> -> vector<8x64xf32>
    %91 = vector.broadcast %89 : vector<1x64xf32> to vector<8x64xf32>
    %92 = arith.addf %90, %91 : vector<8x64xf32>
    %cst_61 = arith.constant 0.00999999977 : f32
    %93 = vector.broadcast %cst_61 : f32 to vector<8x64xf32>
    %94 = arith.mulf %93, %92 : vector<8x64xf32>
    %95 = arith.maximumf %92, %94 : vector<8x64xf32>
    %c0_62 = arith.constant 0 : index
    %c0_63 = arith.constant 0 : index
    %96 = vector.load %arg25[%c0_62, %c0_63] : memref<64x384xf32, #tpu.memory_space<vmem>>, vector<64x384xf32>
    %c0_64 = arith.constant 0 : index
    %c0_65 = arith.constant 0 : index
    %97 = vector.load %arg26[%c0_64, %c0_65] : memref<1x384xf32, #tpu.memory_space<vmem>>, vector<1x384xf32>
    %cst_66 = arith.constant dense<0.000000e+00> : vector<8x384xf32>
    %98 = tpu.matmul %95, %96, %cst_66 {dimension_numbers = #tpu.dot_dimension_numbers<[1], [0], [0], [1], [0, 0, 1, 1], [], []>} : vector<8x64xf32>, vector<64x384xf32>, vector<8x384xf32> -> vector<8x384xf32>
    %99 = vector.broadcast %97 : vector<1x384xf32> to vector<8x384xf32>
    %100 = arith.addf %98, %99 : vector<8x384xf32>
    %101 = vector.extract_strided_slice %100 {offsets = [0, 0], sizes = [8, 320], strides = [1, 1]} : vector<8x384xf32> to vector<8x320xf32>
    %102 = vector.extract_strided_slice %100 {offsets = [0, 320], sizes = [8, 64], strides = [1, 1]} : vector<8x384xf32> to vector<8x64xf32>
    %103 = vector.extract_strided_slice %101 {offsets = [0, 0], sizes = [8, 160], strides = [1, 1]} : vector<8x320xf32> to vector<8x160xf32>
    %104 = vector.extract_strided_slice %101 {offsets = [0, 160], sizes = [8, 160], strides = [1, 1]} : vector<8x320xf32> to vector<8x160xf32>
    %c0_67 = arith.constant 0 : index
    %c0_68 = arith.constant 0 : index
    %105 = vector.load %arg4[%c0_67, %c0_68] : memref<1x64xf32, #tpu.memory_space<vmem>>, vector<1x64xf32>
    %cst_69 = arith.constant -8.000000e+00 : f32
    %106 = vector.broadcast %cst_69 : f32 to vector<1x64xf32>
    %107 = arith.subf %105, %106 : vector<1x64xf32>
    %cst_70 = arith.constant 0.000000e+00 : f32
    %108 = vector.broadcast %cst_70 : f32 to vector<1x64xf32>
    %109 = arith.maximumf %107, %108 : vector<1x64xf32>
    %110 = math.absf %107 : vector<1x64xf32>
    %cst_71 = arith.constant 0.000000e+00 : f32
    %111 = vector.broadcast %cst_71 : f32 to vector<1x64xf32>
    %112 = arith.subf %111, %110 : vector<1x64xf32>
    %113 = math.exp %112 : vector<1x64xf32>
    %cst_72 = arith.constant 1.000000e+00 : f32
    %114 = vector.broadcast %cst_72 : f32 to vector<1x64xf32>
    %115 = arith.addf %114, %113 : vector<1x64xf32>
    %116 = math.log %115 : vector<1x64xf32>
    %117 = arith.addf %109, %116 : vector<1x64xf32>
    %cst_73 = arith.constant -8.000000e+00 : f32
    %118 = vector.broadcast %cst_73 : f32 to vector<1x64xf32>
    %119 = arith.addf %118, %117 : vector<1x64xf32>
    %cst_74 = arith.constant 8.000000e+00 : f32
    %120 = vector.broadcast %cst_74 : f32 to vector<1x64xf32>
    %121 = arith.subf %120, %119 : vector<1x64xf32>
    %cst_75 = arith.constant 0.000000e+00 : f32
    %122 = vector.broadcast %cst_75 : f32 to vector<1x64xf32>
    %123 = arith.maximumf %121, %122 : vector<1x64xf32>
    %124 = math.absf %121 : vector<1x64xf32>
    %cst_76 = arith.constant 0.000000e+00 : f32
    %125 = vector.broadcast %cst_76 : f32 to vector<1x64xf32>
    %126 = arith.subf %125, %124 : vector<1x64xf32>
    %127 = math.exp %126 : vector<1x64xf32>
    %cst_77 = arith.constant 1.000000e+00 : f32
    %128 = vector.broadcast %cst_77 : f32 to vector<1x64xf32>
    %129 = arith.addf %128, %127 : vector<1x64xf32>
    %130 = math.log %129 : vector<1x64xf32>
    %131 = arith.addf %123, %130 : vector<1x64xf32>
    %cst_78 = arith.constant 8.000000e+00 : f32
    %132 = vector.broadcast %cst_78 : f32 to vector<1x64xf32>
    %133 = arith.subf %132, %131 : vector<1x64xf32>
    %134 = arith.subf %0, %102 : vector<8x64xf32>
    %cst_79 = arith.constant 0.000000e+00 : f32
    %135 = vector.broadcast %cst_79 : f32 to vector<1x64xf32>
    %136 = arith.subf %135, %133 : vector<1x64xf32>
    %137 = math.exp %136 : vector<1x64xf32>
    %138 = vector.broadcast %137 : vector<1x64xf32> to vector<8x64xf32>
    %139 = arith.mulf %134, %138 : vector<8x64xf32>
    %cst_80 = arith.constant 5.000000e-01 : f32
    %140 = vector.broadcast %cst_80 : f32 to vector<8x64xf32>
    %141 = arith.mulf %140, %139 : vector<8x64xf32>
    %142 = arith.mulf %141, %139 : vector<8x64xf32>
    %143 = vector.broadcast %133 : vector<1x64xf32> to vector<8x64xf32>
    %144 = arith.addf %142, %143 : vector<8x64xf32>
    %cst_81 = arith.constant 0.918938517 : f32
    %145 = vector.broadcast %cst_81 : f32 to vector<8x64xf32>
    %146 = arith.addf %144, %145 : vector<8x64xf32>
    %cst_82 = arith.constant dense<0.000000e+00> : vector<8xf32>
    %147 = vector.multi_reduction <add>, %146, %cst_82 [1] : vector<8x64xf32> to vector<8xf32>
    %148 = vector.shape_cast %147 : vector<8xf32> to vector<8x1xf32>
    %cst_83 = arith.constant 1.000000e+00 : f32
    %149 = vector.broadcast %cst_83 : f32 to vector<8x8xf32>
    %150 = arith.addf %149, %24 : vector<8x8xf32>
    %151 = arith.mulf %22, %22 : vector<8x8xf32>
    %152 = arith.subf %150, %151 : vector<8x8xf32>
    %153 = math.exp %24 : vector<8x8xf32>
    %154 = arith.subf %152, %153 : vector<8x8xf32>
    %cst_84 = arith.constant -5.000000e-01 : f32
    %155 = vector.broadcast %cst_84 : f32 to vector<8x8xf32>
    %156 = arith.mulf %155, %154 : vector<8x8xf32>
    %cst_85 = arith.constant dense<0.000000e+00> : vector<8xf32>
    %157 = vector.multi_reduction <add>, %156, %cst_85 [1] : vector<8x8xf32> to vector<8xf32>
    %158 = vector.shape_cast %157 : vector<8xf32> to vector<8x1xf32>
    %c0_86 = arith.constant 0 : index
    %c0_87 = arith.constant 0 : index
    %159 = vector.load %arg6[%c0_86, %c0_87] : memref<16x160xf32, #tpu.memory_space<vmem>>, vector<16x160xf32>
    %cst_88 = arith.constant dense<0.000000e+00> : vector<8x160xf32>
    %160 = tpu.matmul %23, %159, %cst_88 {dimension_numbers = #tpu.dot_dimension_numbers<[1], [0], [0], [1], [0, 0, 1, 1], [], []>} : vector<8x16xf32>, vector<16x160xf32>, vector<8x160xf32> -> vector<8x160xf32>
    %c0_89 = arith.constant 0 : index
    %c0_90 = arith.constant 0 : index
    %161 = vector.load %arg6[%c0_89, %c0_90] : memref<16x160xf32, #tpu.memory_space<vmem>>, vector<16x160xf32>
    %cst_91 = arith.constant dense<0.000000e+00> : vector<8x160xf32>
    %162 = tpu.matmul %25, %161, %cst_91 {dimension_numbers = #tpu.dot_dimension_numbers<[1], [0], [0], [1], [0, 0, 1, 1], [], []>} : vector<8x16xf32>, vector<16x160xf32>, vector<8x160xf32> -> vector<8x160xf32>
    %163 = arith.subf %104, %162 : vector<8x160xf32>
    %cst_92 = arith.constant -1.000000e+00 : f32
    %164 = vector.broadcast %cst_92 : f32 to vector<8x160xf32>
    %165 = arith.addf %164, %163 : vector<8x160xf32>
    %166 = arith.subf %162, %104 : vector<8x160xf32>
    %167 = math.exp %166 : vector<8x160xf32>
    %168 = arith.addf %165, %167 : vector<8x160xf32>
    %169 = arith.subf %103, %160 : vector<8x160xf32>
    %170 = arith.mulf %169, %169 : vector<8x160xf32>
    %cst_93 = arith.constant 0.000000e+00 : f32
    %171 = vector.broadcast %cst_93 : f32 to vector<8x160xf32>
    %172 = arith.subf %171, %104 : vector<8x160xf32>
    %173 = math.exp %172 : vector<8x160xf32>
    %174 = arith.mulf %170, %173 : vector<8x160xf32>
    %175 = arith.addf %168, %174 : vector<8x160xf32>
    %cst_94 = arith.constant 5.000000e-01 : f32
    %176 = vector.broadcast %cst_94 : f32 to vector<8x160xf32>
    %177 = arith.mulf %176, %175 : vector<8x160xf32>
    %c0_95 = arith.constant 0 : index
    %c0_96 = arith.constant 0 : index
    %178 = vector.load %arg5[%c0_95, %c0_96] : memref<10x160xf32, #tpu.memory_space<vmem>>, vector<10x160xf32>
    %cst_97 = arith.constant dense<0.000000e+00> : vector<8x160xf32>
    %179 = tpu.matmul %76, %178, %cst_97 {dimension_numbers = #tpu.dot_dimension_numbers<[1], [0], [0], [1], [0, 0, 1, 1], [], []>} : vector<8x10xf32>, vector<10x160xf32>, vector<8x160xf32> -> vector<8x160xf32>
    %180 = arith.mulf %179, %177 : vector<8x160xf32>
    %cst_98 = arith.constant dense<0.000000e+00> : vector<8xf32>
    %181 = vector.multi_reduction <add>, %180, %cst_98 [1] : vector<8x160xf32> to vector<8xf32>
    %182 = vector.shape_cast %181 : vector<8xf32> to vector<8x1xf32>
    %183 = math.log %76 : vector<8x10xf32>
    %184 = arith.mulf %76, %183 : vector<8x10xf32>
    %cst_99 = arith.constant dense<0.000000e+00> : vector<8xf32>
    %185 = vector.multi_reduction <add>, %184, %cst_99 [1] : vector<8x10xf32> to vector<8xf32>
    %186 = vector.shape_cast %185 : vector<8xf32> to vector<8x1xf32>
    %cst_100 = arith.constant 2.30258512 : f32
    %187 = vector.broadcast %cst_100 : f32 to vector<8x10xf32>
    %188 = arith.addf %183, %187 : vector<8x10xf32>
    %189 = arith.mulf %76, %188 : vector<8x10xf32>
    %cst_101 = arith.constant dense<0.000000e+00> : vector<8xf32>
    %190 = vector.multi_reduction <add>, %189, %cst_101 [1] : vector<8x10xf32> to vector<8xf32>
    %191 = vector.shape_cast %190 : vector<8xf32> to vector<8x1xf32>
    %cst_102 = arith.constant dense<0xFF800000> : vector<8xf32>
    %192 = vector.multi_reduction <maximumf>, %76, %cst_102 [1] : vector<8x10xf32> to vector<8xf32>
    %193 = vector.shape_cast %192 : vector<8xf32> to vector<8x1xf32>
    %194 = tpu.iota {dimensions = array<i32: 0>} : vector<8x1xi32>
    %c2_i32 = arith.constant 2 : i32
    %195 = vector.broadcast %c2_i32 : i32 to vector<8x1xi32>
    %196 = arith.cmpi slt, %194, %195 : vector<8x1xi32>
    %197 = arith.extui %196 : vector<8x1xi1> to vector<8x1xi32>
    %198 = arith.sitofp %197 : vector<8x1xi32> to vector<8x1xf32>
    %199 = arith.mulf %148, %198 : vector<8x1xf32>
    %cst_103 = arith.constant dense<0.000000e+00> : vector<1xf32>
    %200 = vector.multi_reduction <add>, %199, %cst_103 [0] : vector<8x1xf32> to vector<1xf32>
    %201 = vector.shape_cast %200 : vector<1xf32> to vector<1x1xf32>
    %cst_104 = arith.constant 5.000000e-01 : f32
    %202 = vector.broadcast %cst_104 : f32 to vector<1x1xf32>
    %203 = arith.mulf %201, %202 : vector<1x1xf32>
    %204 = arith.mulf %158, %198 : vector<8x1xf32>
    %cst_105 = arith.constant dense<0.000000e+00> : vector<1xf32>
    %205 = vector.multi_reduction <add>, %204, %cst_105 [0] : vector<8x1xf32> to vector<1xf32>
    %206 = vector.shape_cast %205 : vector<1xf32> to vector<1x1xf32>
    %cst_106 = arith.constant 5.000000e-01 : f32
    %207 = vector.broadcast %cst_106 : f32 to vector<1x1xf32>
    %208 = arith.mulf %206, %207 : vector<1x1xf32>
    %209 = arith.mulf %182, %198 : vector<8x1xf32>
    %cst_107 = arith.constant dense<0.000000e+00> : vector<1xf32>
    %210 = vector.multi_reduction <add>, %209, %cst_107 [0] : vector<8x1xf32> to vector<1xf32>
    %211 = vector.shape_cast %210 : vector<1xf32> to vector<1x1xf32>
    %cst_108 = arith.constant 5.000000e-01 : f32
    %212 = vector.broadcast %cst_108 : f32 to vector<1x1xf32>
    %213 = arith.mulf %211, %212 : vector<1x1xf32>
    %214 = arith.mulf %191, %198 : vector<8x1xf32>
    %cst_109 = arith.constant dense<0.000000e+00> : vector<1xf32>
    %215 = vector.multi_reduction <add>, %214, %cst_109 [0] : vector<8x1xf32> to vector<1xf32>
    %216 = vector.shape_cast %215 : vector<1xf32> to vector<1x1xf32>
    %cst_110 = arith.constant 5.000000e-01 : f32
    %217 = vector.broadcast %cst_110 : f32 to vector<1x1xf32>
    %218 = arith.mulf %216, %217 : vector<1x1xf32>
    %219 = arith.mulf %193, %198 : vector<8x1xf32>
    %cst_111 = arith.constant dense<0.000000e+00> : vector<1xf32>
    %220 = vector.multi_reduction <add>, %219, %cst_111 [0] : vector<8x1xf32> to vector<1xf32>
    %221 = vector.shape_cast %220 : vector<1xf32> to vector<1x1xf32>
    %cst_112 = arith.constant 5.000000e-01 : f32
    %222 = vector.broadcast %cst_112 : f32 to vector<1x1xf32>
    %223 = arith.mulf %221, %222 : vector<1x1xf32>
    %cst_113 = arith.constant 0.000000e+00 : f32
    %224 = vector.broadcast %cst_113 : f32 to vector<1x1xf32>
    %225 = arith.subf %224, %223 : vector<1x1xf32>
    %226 = arith.mulf %186, %198 : vector<8x1xf32>
    %cst_114 = arith.constant dense<0.000000e+00> : vector<1xf32>
    %227 = vector.multi_reduction <add>, %226, %cst_114 [0] : vector<8x1xf32> to vector<1xf32>
    %228 = vector.shape_cast %227 : vector<1xf32> to vector<1x1xf32>
    %cst_115 = arith.constant 5.000000e-01 : f32
    %229 = vector.broadcast %cst_115 : f32 to vector<1x1xf32>
    %230 = arith.mulf %228, %229 : vector<1x1xf32>
    %231 = vector.broadcast %198 : vector<8x1xf32> to vector<8x10xf32>
    %232 = arith.mulf %76, %231 : vector<8x10xf32>
    %cst_116 = arith.constant dense<0.000000e+00> : vector<10xf32>
    %233 = vector.multi_reduction <add>, %232, %cst_116 [0] : vector<8x10xf32> to vector<10xf32>
    %234 = vector.shape_cast %233 : vector<10xf32> to vector<1x10xf32>
    %cst_117 = arith.constant 5.000000e-01 : f32
    %235 = vector.broadcast %cst_117 : f32 to vector<1x10xf32>
    %236 = arith.mulf %234, %235 : vector<1x10xf32>
    %237 = math.log %236 : vector<1x10xf32>
    %cst_118 = arith.constant 2.30258512 : f32
    %238 = vector.broadcast %cst_118 : f32 to vector<1x10xf32>
    %239 = arith.addf %237, %238 : vector<1x10xf32>
    %240 = arith.mulf %236, %239 : vector<1x10xf32>
    %cst_119 = arith.constant dense<0.000000e+00> : vector<1xf32>
    %241 = vector.multi_reduction <add>, %240, %cst_119 [1] : vector<1x10xf32> to vector<1xf32>
    %242 = vector.shape_cast %241 : vector<1xf32> to vector<1x1xf32>
    %243 = tpu.iota {dimensions = array<i32: 1>} : vector<1x128xi32>
    %cst_120 = arith.constant 0.000000e+00 : f32
    %244 = vector.broadcast %cst_120 : f32 to vector<1x128xf32>
    %c0_i32 = arith.constant 0 : i32
    %245 = vector.broadcast %c0_i32 : i32 to vector<1x128xi32>
    %246 = arith.cmpi eq, %243, %245 : vector<1x128xi32>
    %247 = vector.shape_cast %203 : vector<1x1xf32> to vector<1x1xf32>
    %248 = vector.broadcast %247 : vector<1x1xf32> to vector<1x128xf32>
    %249 = arith.select %246, %248, %244 : vector<1x128xi1>, vector<1x128xf32>
    %c1_i32 = arith.constant 1 : i32
    %250 = vector.broadcast %c1_i32 : i32 to vector<1x128xi32>
    %251 = arith.cmpi eq, %243, %250 : vector<1x128xi32>
    %252 = vector.shape_cast %208 : vector<1x1xf32> to vector<1x1xf32>
    %253 = vector.broadcast %252 : vector<1x1xf32> to vector<1x128xf32>
    %254 = arith.select %251, %253, %249 : vector<1x128xi1>, vector<1x128xf32>
    %c2_i32_121 = arith.constant 2 : i32
    %255 = vector.broadcast %c2_i32_121 : i32 to vector<1x128xi32>
    %256 = arith.cmpi eq, %243, %255 : vector<1x128xi32>
    %257 = vector.shape_cast %213 : vector<1x1xf32> to vector<1x1xf32>
    %258 = vector.broadcast %257 : vector<1x1xf32> to vector<1x128xf32>
    %259 = arith.select %256, %258, %254 : vector<1x128xi1>, vector<1x128xf32>
    %c3_i32 = arith.constant 3 : i32
    %260 = vector.broadcast %c3_i32 : i32 to vector<1x128xi32>
    %261 = arith.cmpi eq, %243, %260 : vector<1x128xi32>
    %262 = vector.shape_cast %242 : vector<1x1xf32> to vector<1x1xf32>
    %263 = vector.broadcast %262 : vector<1x1xf32> to vector<1x128xf32>
    %264 = arith.select %261, %263, %259 : vector<1x128xi1>, vector<1x128xf32>
    %c4_i32 = arith.constant 4 : i32
    %265 = vector.broadcast %c4_i32 : i32 to vector<1x128xi32>
    %266 = arith.cmpi eq, %243, %265 : vector<1x128xi32>
    %267 = vector.shape_cast %218 : vector<1x1xf32> to vector<1x1xf32>
    %268 = vector.broadcast %267 : vector<1x1xf32> to vector<1x128xf32>
    %269 = arith.select %266, %268, %264 : vector<1x128xi1>, vector<1x128xf32>
    %c5_i32 = arith.constant 5 : i32
    %270 = vector.broadcast %c5_i32 : i32 to vector<1x128xi32>
    %271 = arith.cmpi eq, %243, %270 : vector<1x128xi32>
    %272 = vector.shape_cast %225 : vector<1x1xf32> to vector<1x1xf32>
    %273 = vector.broadcast %272 : vector<1x1xf32> to vector<1x128xf32>
    %274 = arith.select %271, %273, %269 : vector<1x128xi1>, vector<1x128xf32>
    %c6_i32 = arith.constant 6 : i32
    %275 = vector.broadcast %c6_i32 : i32 to vector<1x128xi32>
    %276 = arith.cmpi eq, %243, %275 : vector<1x128xi32>
    %277 = vector.shape_cast %230 : vector<1x1xf32> to vector<1x1xf32>
    %278 = vector.broadcast %277 : vector<1x1xf32> to vector<1x128xf32>
    %279 = arith.select %276, %278, %274 : vector<1x128xi1>, vector<1x128xf32>
    %c0_122 = arith.constant 0 : index
    %c0_123 = arith.constant 0 : index
    %280 = vector.load %arg27[%c0_122, %c0_123] : memref<8x48xf32, #tpu.memory_space<vmem>>, vector<8x48xf32>
    tpu.vector_store %arg27[%c0_122, %c0_123], %21 {strides = array<i32>} : memref<8x48xf32, #tpu.memory_space<vmem>>, vector<8x48xf32>,
    %c0_124 = arith.constant 0 : index
    %c0_125 = arith.constant 0 : index
    %281 = vector.load %arg28[%c0_124, %c0_125] : memref<8x8xf32, #tpu.memory_space<vmem>>, vector<8x8xf32>
    tpu.vector_store %arg28[%c0_124, %c0_125], %31 {strides = array<i32>} : memref<8x8xf32, #tpu.memory_space<vmem>>, vector<8x8xf32>,
    %c0_126 = arith.constant 0 : index
    %c0_127 = arith.constant 0 : index
    %282 = vector.load %arg29[%c0_126, %c0_127] : memref<8x16xf32, #tpu.memory_space<vmem>>, vector<8x16xf32>
    tpu.vector_store %arg29[%c0_126, %c0_127], %37 {strides = array<i32>} : memref<8x16xf32, #tpu.memory_space<vmem>>, vector<8x16xf32>,
    %c0_128 = arith.constant 0 : index
    %c0_129 = arith.constant 0 : index
    %283 = vector.load %arg30[%c0_128, %c0_129] : memref<8x10xf32, #tpu.memory_space<vmem>>, vector<8x10xf32>
    tpu.vector_store %arg30[%c0_128, %c0_129], %76 {strides = array<i32>} : memref<8x10xf32, #tpu.memory_space<vmem>>, vector<8x10xf32>,
    %c0_130 = arith.constant 0 : index
    %c0_131 = arith.constant 0 : index
    %284 = vector.load %arg31[%c0_130, %c0_131] : memref<8x10xf32, #tpu.memory_space<vmem>>, vector<8x10xf32>
    tpu.vector_store %arg31[%c0_130, %c0_131], %63 {strides = array<i32>} : memref<8x10xf32, #tpu.memory_space<vmem>>, vector<8x10xf32>,
    %c0_132 = arith.constant 0 : index
    %c0_133 = arith.constant 0 : index
    %285 = vector.load %arg32[%c0_132, %c0_133] : memref<8x64xf32, #tpu.memory_space<vmem>>, vector<8x64xf32>
    tpu.vector_store %arg32[%c0_132, %c0_133], %102 {strides = array<i32>} : memref<8x64xf32, #tpu.memory_space<vmem>>, vector<8x64xf32>,
    %c0_134 = arith.constant 0 : index
    %c0_135 = arith.constant 0 : index
    %286 = vector.load %arg33[%c0_134, %c0_135] : memref<8x320xf32, #tpu.memory_space<vmem>>, vector<8x320xf32>
    tpu.vector_store %arg33[%c0_134, %c0_135], %101 {strides = array<i32>} : memref<8x320xf32, #tpu.memory_space<vmem>>, vector<8x320xf32>,
    %c0_136 = arith.constant 0 : index
    %c0_137 = arith.constant 0 : index
    %287 = vector.load %arg34[%c0_136, %c0_137] : memref<1x128xf32, #tpu.memory_space<vmem>>, vector<1x128xf32>
    tpu.vector_store %arg34[%c0_136, %c0_137], %279 {strides = array<i32>} : memref<1x128xf32, #tpu.memory_space<vmem>>, vector<1x128xf32>,
    return
  }
  func.func @transform_0(%arg0: i32) -> (i32, i32) {
    %c0_i32 = arith.constant 0 : i32
    %c0_i32_0 = arith.constant 0 : i32
    %c0_i32_1 = arith.constant 0 : i32
    return %c0_i32, %c0_i32_0 : i32, i32
  }
  func.func @transform_1(%arg0: i32) -> (i32, i32) {
    %c0_i32 = arith.constant 0 : i32
    %c0_i32_0 = arith.constant 0 : i32
    %c0_i32_1 = arith.constant 0 : i32
    return %c0_i32, %c0_i32_0 : i32, i32
  }
  func.func @transform_2(%arg0: i32) -> (i32, i32) {
    %c0_i32 = arith.constant 0 : i32
    %c0_i32_0 = arith.constant 0 : i32
    %c0_i32_1 = arith.constant 0 : i32
    return %c0_i32, %c0_i32_0 : i32, i32
  }
  func.func @transform_3(%arg0: i32) -> (i32, i32) {
    %c0_i32 = arith.constant 0 : i32
    %c0_i32_0 = arith.constant 0 : i32
    %c0_i32_1 = arith.constant 0 : i32
    return %c0_i32, %c0_i32_0 : i32, i32
  }
  func.func @transform_4(%arg0: i32) -> (i32, i32) {
    %c0_i32 = arith.constant 0 : i32
    %c0_i32_0 = arith.constant 0 : i32
    %c0_i32_1 = arith.constant 0 : i32
    return %c0_i32, %c0_i32_0 : i32, i32
  }
  func.func @transform_5(%arg0: i32) -> (i32, i32) {
    %c0_i32 = arith.constant 0 : i32
    %c0_i32_0 = arith.constant 0 : i32
    %c0_i32_1 = arith.constant 0 : i32
    return %c0_i32, %c0_i32_0 : i32, i32
  }
  func.func @transform_6(%arg0: i32) -> (i32, i32) {
    %c0_i32 = arith.constant 0 : i32
    %c0_i32_0 = arith.constant 0 : i32
    %c0_i32_1 = arith.constant 0 : i32
    return %c0_i32, %c0_i32_0 : i32, i32
  }
  func.func @transform_7(%arg0: i32) -> (i32, i32) {
    %c0_i32 = arith.constant 0 : i32
    %c0_i32_0 = arith.constant 0 : i32
    %c0_i32_1 = arith.constant 0 : i32
    return %c0_i32, %c0_i32_0 : i32, i32
  }
  func.func @transform_8(%arg0: i32) -> (i32, i32) {
    %c0_i32 = arith.constant 0 : i32
    %c0_i32_0 = arith.constant 0 : i32
    %c0_i32_1 = arith.constant 0 : i32
    return %c0_i32, %c0_i32_0 : i32, i32
  }
  func.func @transform_9(%arg0: i32) -> (i32, i32) {
    %c0_i32 = arith.constant 0 : i32
    %c0_i32_0 = arith.constant 0 : i32
    %c0_i32_1 = arith.constant 0 : i32
    return %c0_i32, %c0_i32_0 : i32, i32
  }
  func.func @transform_10(%arg0: i32) -> (i32, i32) {
    %c0_i32 = arith.constant 0 : i32
    %c0_i32_0 = arith.constant 0 : i32
    %c0_i32_1 = arith.constant 0 : i32
    return %c0_i32, %c0_i32_0 : i32, i32
  }
  func.func @transform_11(%arg0: i32) -> (i32, i32) {
    %c0_i32 = arith.constant 0 : i32
    %c0_i32_0 = arith.constant 0 : i32
    %c0_i32_1 = arith.constant 0 : i32
    return %c0_i32, %c0_i32_0 : i32, i32
  }
  func.func @transform_12(%arg0: i32) -> (i32, i32) {
    %c0_i32 = arith.constant 0 : i32
    %c0_i32_0 = arith.constant 0 : i32
    %c0_i32_1 = arith.constant 0 : i32
    return %c0_i32, %c0_i32_0 : i32, i32
  }
  func.func @transform_13(%arg0: i32) -> (i32, i32) {
    %c0_i32 = arith.constant 0 : i32
    %c0_i32_0 = arith.constant 0 : i32
    %c0_i32_1 = arith.constant 0 : i32
    return %c0_i32, %c0_i32_0 : i32, i32
  }
  func.func @transform_14(%arg0: i32) -> (i32, i32) {
    %c0_i32 = arith.constant 0 : i32
    %c0_i32_0 = arith.constant 0 : i32
    %c0_i32_1 = arith.constant 0 : i32
    return %c0_i32, %c0_i32_0 : i32, i32
  }
  func.func @transform_15(%arg0: i32) -> (i32, i32) {
    %c0_i32 = arith.constant 0 : i32
    %c0_i32_0 = arith.constant 0 : i32
    %c0_i32_1 = arith.constant 0 : i32
    return %c0_i32, %c0_i32_0 : i32, i32
  }
  func.func @transform_16(%arg0: i32) -> (i32, i32) {
    %c0_i32 = arith.constant 0 : i32
    %c0_i32_0 = arith.constant 0 : i32
    %c0_i32_1 = arith.constant 0 : i32
    return %c0_i32, %c0_i32_0 : i32, i32
  }
  func.func @transform_17(%arg0: i32) -> (i32, i32) {
    %c0_i32 = arith.constant 0 : i32
    %c0_i32_0 = arith.constant 0 : i32
    %c0_i32_1 = arith.constant 0 : i32
    return %c0_i32, %c0_i32_0 : i32, i32
  }
  func.func @transform_18(%arg0: i32) -> (i32, i32) {
    %c0_i32 = arith.constant 0 : i32
    %c0_i32_0 = arith.constant 0 : i32
    %c0_i32_1 = arith.constant 0 : i32
    return %c0_i32, %c0_i32_0 : i32, i32
  }
  func.func @transform_19(%arg0: i32) -> (i32, i32) {
    %c0_i32 = arith.constant 0 : i32
    %c0_i32_0 = arith.constant 0 : i32
    %c0_i32_1 = arith.constant 0 : i32
    return %c0_i32, %c0_i32_0 : i32, i32
  }
  func.func @transform_20(%arg0: i32) -> (i32, i32) {
    %c0_i32 = arith.constant 0 : i32
    %c0_i32_0 = arith.constant 0 : i32
    %c0_i32_1 = arith.constant 0 : i32
    return %c0_i32, %c0_i32_0 : i32, i32
  }
  func.func @transform_21(%arg0: i32) -> (i32, i32) {
    %c0_i32 = arith.constant 0 : i32
    %c0_i32_0 = arith.constant 0 : i32
    %c0_i32_1 = arith.constant 0 : i32
    return %c0_i32, %c0_i32_0 : i32, i32
  }
  func.func @transform_22(%arg0: i32) -> (i32, i32) {
    %c0_i32 = arith.constant 0 : i32
    %c0_i32_0 = arith.constant 0 : i32
    %c0_i32_1 = arith.constant 0 : i32
    return %c0_i32, %c0_i32_0 : i32, i32
  }
  func.func @transform_23(%arg0: i32) -> (i32, i32) {
    %c0_i32 = arith.constant 0 : i32
    %c0_i32_0 = arith.constant 0 : i32
    %c0_i32_1 = arith.constant 0 : i32
    return %c0_i32, %c0_i32_0 : i32, i32
  }
  func.func @transform_24(%arg0: i32) -> (i32, i32) {
    %c0_i32 = arith.constant 0 : i32
    %c0_i32_0 = arith.constant 0 : i32
    %c0_i32_1 = arith.constant 0 : i32
    return %c0_i32, %c0_i32_0 : i32, i32
  }
  func.func @transform_25(%arg0: i32) -> (i32, i32) {
    %c0_i32 = arith.constant 0 : i32
    %c0_i32_0 = arith.constant 0 : i32
    %c0_i32_1 = arith.constant 0 : i32
    return %c0_i32, %c0_i32_0 : i32, i32
  }
  func.func @transform_26(%arg0: i32) -> (i32, i32) {
    %c0_i32 = arith.constant 0 : i32
    %c0_i32_0 = arith.constant 0 : i32
    %c0_i32_1 = arith.constant 0 : i32
    return %c0_i32, %c0_i32_0 : i32, i32
  }
  func.func @transform_27(%arg0: i32) -> (i32, i32) {
    %c0_i32 = arith.constant 0 : i32
    %c0_i32_0 = arith.constant 0 : i32
    %c0_i32_1 = arith.constant 0 : i32
    return %c0_i32, %c0_i32_0 : i32, i32
  }
  func.func @transform_28(%arg0: i32) -> (i32, i32) {
    %c0_i32 = arith.constant 0 : i32
    %c0_i32_0 = arith.constant 0 : i32
    %c0_i32_1 = arith.constant 0 : i32
    return %c0_i32, %c0_i32_0 : i32, i32
  }
  func.func @transform_29(%arg0: i32) -> (i32, i32) {
    %c0_i32 = arith.constant 0 : i32
    %c0_i32_0 = arith.constant 0 : i32
    %c0_i32_1 = arith.constant 0 : i32
    return %c0_i32, %c0_i32_0 : i32, i32
  }
  func.func @transform_30(%arg0: i32) -> (i32, i32) {
    %c0_i32 = arith.constant 0 : i32
    %c0_i32_0 = arith.constant 0 : i32
    %c0_i32_1 = arith.constant 0 : i32
    return %c0_i32, %c0_i32_0 : i32, i32
  }
  func.func @transform_31(%arg0: i32) -> (i32, i32) {
    %c0_i32 = arith.constant 0 : i32
    %c0_i32_0 = arith.constant 0 : i32
    %c0_i32_1 = arith.constant 0 : i32
    return %c0_i32, %c0_i32_0 : i32, i32
  }
  func.func @transform_32(%arg0: i32) -> (i32, i32) {
    %c0_i32 = arith.constant 0 : i32
    %c0_i32_0 = arith.constant 0 : i32
    %c0_i32_1 = arith.constant 0 : i32
    return %c0_i32, %c0_i32_0 : i32, i32
  }
  func.func @transform_33(%arg0: i32) -> (i32, i32) {
    %c0_i32 = arith.constant 0 : i32
    %c0_i32_0 = arith.constant 0 : i32
    %c0_i32_1 = arith.constant 0 : i32
    return %c0_i32, %c0_i32_0 : i32, i32
  }
}

</mosaic_0001>

<bundles_post_ra>
// kernel: _lambda_.1
= control target key start
LH: loop header
LB: loop body
LE: loop exit
PB: predicated region body
PF: predicated region fallthrough
CT: control target
= control target key end

     0   :  { %s2738_s6 = smov 1   ;;  %s2739_s10 = smov 2   ;;  %s3307_s0 = inlined_call_operand.smem [shape: u32[34], index: -1, kind: input, shape index: {}] }
   0x1   :  { %s2809_s5 = sld [smem:[%s3307_s0]]   ;;  %s2740_s14 = smov 3  }
   0x2   :  { %s2814_s9 = sld [smem:[%s3307_s0 + %s2738_s6]]   ;;  %s2741_s18 = smov 4  }
   0x3   :  { %s2819_s13 = sld [smem:[%s3307_s0 + %s2739_s10]]   ;;  %s2742_s22 = smov 5  }
   0x4   :  { %s2824_s17 = sld [smem:[%s3307_s0 + %s2740_s14]]   ;;  %s2743_s26 = smov 6  }
   0x5   :  { %s2829_s21 = sld [smem:[%s3307_s0 + %s2741_s18]]   ;;  %s2744_s30 = smov 7  }
   0x6   :  { %s2834_s25 = sld [smem:[%s3307_s0 + %s2742_s22]]   ;;  %s2745_s4 = smov 8  }
   0x7   :  { %3316 = sst [smem:[#allocation33_spill]] %s2809_s5  ;;  %s2746_s10 = smov 9  }
   0x8   :  { %3317 = sst [smem:[#allocation34_spill]] %s2814_s9  ;;  %s2747_s15 = smov 10  }
   0x9   :  { %3318 = sst [smem:[#allocation35_spill]] %s2819_s13  ;;  %s2748_s20 = smov 11  }
   0xa   :  { %s2839_s29 = sld [smem:[%s3307_s0 + %s2743_s26]]   ;;  %s2749_s26 = smov 12  }
   0xb   :  { %3319 = sst [smem:[#allocation36_spill]] %s2829_s21  ;;  %s2750_s1 = smov 13  }
   0xc   :  { %s2844_s3 = sld [smem:[%s3307_s0 + %s2744_s30]]   ;;  %s2751_s7 = smov 14  }
   0xd   :  { %s2849_s8 = sld [smem:[%s3307_s0 + %s2745_s4]]   ;;  %s2753_s22 = smov 16  }
   0xe   :  { %s2854_s14 = sld [smem:[%s3307_s0 + %s2746_s10]]   ;;  %s2754_s28 = smov 17  }
   0xf   :  { %s2859_s19 = sld [smem:[%s3307_s0 + %s2747_s15]]   ;;  %s2752_s15 = smov 15  }
  0x10   :  { %3320 = sst [smem:[#allocation37_spill]] %s2839_s29 }
  0x11   :  { %s2864_s24 = sld [smem:[%s3307_s0 + %s2748_s20]]  }
  0x12   :  { %s2869_s30 = sld [smem:[%s3307_s0 + %s2749_s26]]  }
  0x13   :  { %3321 = sst [smem:[#allocation38_spill]] %s2849_s8 }
  0x14   :  { %s2874_s6 = sld [smem:[%s3307_s0 + %s2750_s1]]  }
  0x15   :  { %s2879_s12 = sld [smem:[%s3307_s0 + %s2751_s7]]   ;;  %s2755_s7 = smov 18  }
  0x16   :  { %s2884_s20 = sld [smem:[%s3307_s0 + %s2752_s15]]   ;;  %s2756_s15 = smov 19  }
  0x17   :  { %s2889_s27 = sld [smem:[%s3307_s0 + %s2753_s22]]   ;;  %s2757_s22 = smov 20  }
  0x18   :  { %s2894_s4 = sld [smem:[%s3307_s0 + %s2754_s28]]   ;;  %s2758_s28 = smov 21  }
  0x19   :  { %s2899_s21 = sld [smem:[%s3307_s0 + %s2755_s7]]   ;;  %s2759_s7 = smov 22  }
  0x1a   :  { %s2909_s13 = sld [smem:[%s3307_s0 + %s2757_s22]]   ;;  %s2761_s22 = smov 24  }
  0x1b   :  { %s2919_s9 = sld [smem:[%s3307_s0 + %s2759_s7]]   ;;  %s2763_s7 = smov 26  }
  0x1c   :  { %3322 = sst [smem:[#allocation39_spill]] %s2884_s20 }
  0x1d   :  { %s2904_s20 = sld [smem:[%s3307_s0 + %s2756_s15]]   ;;  %s2760_s15 = smov 23  }
  0x1e   :  { %3323 = sst [smem:[#allocation40_spill]] %s2894_s4 }
  0x1f   :  { %s2914_s4 = sld [smem:[%s3307_s0 + %s2758_s28]]   ;;  %s2762_s28 = smov 25  }
  0x20   :  { %s2929_s8 = sld [smem:[%s3307_s0 + %s2761_s22]]   ;;  %s2765_s22 = smov 28  }
  0x21   :  { %3325 = sst [smem:[#allocation42_spill]] %s2919_s9 }
  0x22   :  { %s2934_s5 = sld [smem:[%s3307_s0 + %s2762_s28]]   ;;  %s2766_s28 = smov 29  }
  0x23   :  { %3324 = sst [smem:[#allocation41_spill]] %s2904_s20 }
  0x24   :  { %s2924_s20 = sld [smem:[%s3307_s0 + %s2760_s15]]   ;;  %s2764_s15 = smov 27  }
  0x25   :  { %s2939_s9 = sld [smem:[%s3307_s0 + %s2763_s7]]   ;;  %s2767_s7 = smov 30  }
  0x26   :  { %3326 = sst [smem:[#allocation43_spill]] %s2929_s8 }
  0x27   :  { %s2944_s29 = sld [smem:[%s3307_s0 + %s2764_s15]]   ;;  %s2768_s15 = smov 31  }
  0x28   :  { %3327 = sst [smem:[#allocation44_spill]] %s2934_s5 }
  0x29   :  { %s2949_s8 = sld [smem:[%s3307_s0 + %s2765_s22]]   ;;  %s2769_s22 = smov 32  }
  0x2a   :  { %s2954_s5 = sld [smem:[%s3307_s0 + %s2766_s28]]   ;;  %s2770_s28 = smov 33  }
  0x2b   :  { %3328 = sst [smem:[#allocation45_spill]] %s2939_s9 }
  0x2c   :  { %s2959_s9 = sld [smem:[%s3307_s0 + %s2767_s7]]  }
  0x2d   :  { %3329 = sst [smem:[#allocation46_spill]] %s2944_s29 }
  0x2e   :  { %s2964_s29 = sld [smem:[%s3307_s0 + %s2768_s15]]  }
  0x2f   :  { %3330 = sst [smem:[#allocation47_spill]] %s2949_s8 }
  0x30   :  { %3331 = sst [smem:[#allocation48_spill]] %s2954_s5 }
  0x31   :  { %s2969_s8 = sld [smem:[%s3307_s0 + %s2769_s22]]  }
  0x32   :  { %s2974_s5 = sld [smem:[%s3307_s0 + %s2770_s28]]  }
  0x33   :  { %73 = vsyncpa [#allocation3], 0 }
  0x34   :  { %74 = vsyncpa [#allocation5], 0 }
  0x35   :  { %75 = vsyncpa [#allocation8], 0 }
  0x36   :  { %76 = vsyncpa [#allocation11], 0 }
  0x37   :  { %77 = vsyncpa [#allocation14], 0 }
  0x38   :  { %78 = vsyncpa [#allocation17], 0 }
  0x39   :  { %79 = vsyncpa [#allocation20], 0 }
  0x3a   :  { %80 = vsyncpa [#allocation23], 0  ;;  %s2771_s7 = smov [#allocation4]   ;;  %s2392_s11 = scalar_lea.hbm %s2834_s25, 512 }
  0x3b   :  { %s104_s10 = sshll.u32 %s2771_s7, 4  ;;  %p2393_p0 = scmp.ne.s32.totalorder %s2834_s25, %s2392_s11  ;;  %s105_s10 = int_to_ptr.vmem [resolvable:$true] %s104_s10 }
  0x3c   :  { %p2396_p1 = scmp.lt.u32.totalorder %s2392_s11, %s2834_s25 }
  0x3e   :  { %p2398_p2 = pnand %p2396_p1, %p2393_p0 }
  0x40   :  { %2401 = shalt.err (!%p2398_p2)
}
  0x41   :  { %s2402_s0 = scalar_lea.vmem %s105_s10, 512  ;;  %p2407_p4 = scmp.lt.s32.totalorder %s105_s10, %s105_s10 }
  0x42   :  { %p2403_p3 = scmp.ne.s32.totalorder %s105_s10, %s2402_s0  ;;  %p2408_p5 = scmp.lt.s32.totalorder %s2402_s0, %s2402_s0 }
  0x44   :  { %p2409_p6 = por %p2408_p5, %p2407_p4 }
  0x46   :  { %p2410_p7 = pnand %p2409_p6, %p2403_p3 }
  0x48   :  { %2413 = shalt.err (!%p2410_p7)
}
  0x49   :  { %s2772_s15 = smov 256   ;;  %s2773_s16 = smov 16  }
  0x4a   :  { %110 = dma.hbm_to_vmem [thread:$0]  %s2834_s25, 512, %s105_s10, [#allocation5], %s2772_s15, %s2772_s15, %s2773_s16  }
  0x4b   :  { %s2774_s18 = smov [#allocation7]   ;;  %s2775_s23 = smov [#allocation10]  }
  0x4c   :  { %s131_s22 = sshll.u32 %s2774_s18, 4  ;;  %s153_s26 = sshll.u32 %s2775_s23, 4  ;;  %s132_s22 = int_to_ptr.vmem [resolvable:$true] %s131_s22  ;;  %s154_s26 = int_to_ptr.vmem [resolvable:$true] %s153_s26 }
  0x4d   :  { %s2414_s28 = scalar_lea.hbm %s2854_s14, 16 }
  0x4e   :  { %p2415_p8 = scmp.ne.s32.totalorder %s2854_s14, %s2414_s28  ;;  %p2418_p9 = scmp.lt.u32.totalorder %s2414_s28, %s2854_s14 }
  0x50   :  { %p2420_p10 = pnand %p2418_p9, %p2415_p8 }
  0x52   :  { %2423 = shalt.err (!%p2420_p10)
}
  0x53   :  { %s2424_s1 = scalar_lea.vmem %s132_s22, 16  ;;  %s2428_s2 = scalar_lea.vmem %s132_s22, 32 }
  0x54   :  { %p2425_p11 = scmp.ne.s32.totalorder %s132_s22, %s2424_s1  ;;  %p2429_p12 = scmp.lt.s32.totalorder %s132_s22, %s132_s22 }
  0x55   :  { %p2430_p13 = scmp.lt.s32.totalorder %s2428_s2, %s2424_s1 }
  0x57   :  { %p2431_p0 = por %p2430_p13, %p2429_p12 }
  0x59   :  { %p2432_p1 = pnand %p2431_p0, %p2425_p11 }
  0x5b   :  { %2435 = shalt.err (!%p2432_p1)
}
  0x5c   :  { %134 = dma.hbm_to_vmem [thread:$0]  %s2854_s14, 16, %s132_s22, [#allocation8]  }
  0x5d   :  { %s2436_s25 = scalar_lea.hbm %s2864_s24, 16 }
  0x5e   :  { %p2437_p2 = scmp.ne.s32.totalorder %s2864_s24, %s2436_s25  ;;  %p2440_p3 = scmp.lt.u32.totalorder %s2436_s25, %s2864_s24 }
  0x60   :  { %p2442_p4 = pnand %p2440_p3, %p2437_p2 }
  0x62   :  { %2445 = shalt.err (!%p2442_p4)
}
  0x63   :  { %s2446_s7 = scalar_lea.vmem %s154_s26, 16  ;;  %s2450_s10 = scalar_lea.vmem %s154_s26, 32 }
  0x64   :  { %p2447_p5 = scmp.ne.s32.totalorder %s154_s26, %s2446_s7  ;;  %p2451_p6 = scmp.lt.s32.totalorder %s154_s26, %s154_s26 }
  0x65   :  { %p2452_p7 = scmp.lt.s32.totalorder %s2450_s10, %s2446_s7 }
  0x67   :  { %p2453_p8 = por %p2452_p7, %p2451_p6 }
  0x69   :  { %p2454_p9 = pnand %p2453_p8, %p2447_p5 }
  0x6b   :  { %2457 = shalt.err (!%p2454_p9)
}
  0x6c   :  { %156 = dma.hbm_to_vmem [thread:$0]  %s2864_s24, 16, %s154_s26, [#allocation11]  }
  0x6d   :  { %s2776_s14 = smov [#allocation13]   ;;  %s2777_s0 = smov [#allocation16]  }
  0x6e   :  { %s172_s11 = sshll.u32 %s2776_s14, 4  ;;  %s197_s15 = sshll.u32 %s2777_s0, 4  ;;  %s173_s11 = int_to_ptr.vmem [resolvable:$true] %s172_s11  ;;  %s198_s15 = int_to_ptr.vmem [resolvable:$true] %s197_s15 }
  0x6f   :  { %s2458_s16 = scalar_lea.hbm %s2874_s6, 256 }
  0x70   :  { %p2459_p10 = scmp.ne.s32.totalorder %s2874_s6, %s2458_s16  ;;  %p2462_p11 = scmp.lt.u32.totalorder %s2458_s16, %s2874_s6 }
  0x72   :  { %p2464_p12 = pnand %p2462_p11, %p2459_p10 }
  0x74   :  { %2467 = shalt.err (!%p2464_p12)
}
  0x75   :  { %s2468_s18 = scalar_lea.vmem %s173_s11, 256  ;;  %p2473_p0 = scmp.lt.s32.totalorder %s173_s11, %s173_s11 }
  0x76   :  { %p2469_p13 = scmp.ne.s32.totalorder %s173_s11, %s2468_s18  ;;  %p2474_p1 = scmp.lt.s32.totalorder %s2468_s18, %s2468_s18 }
  0x78   :  { %p2475_p2 = por %p2474_p1, %p2473_p0 }
  0x7a   :  { %p2476_p3 = pnand %p2475_p2, %p2469_p13 }
  0x7c   :  { %2479 = shalt.err (!%p2476_p3)
}
  0x7d   :  { %s2778_s22 = smov 128   ;;  %s2779_s24 = smov 8  }
  0x7e   :  { %178 = dma.hbm_to_vmem [thread:$0]  %s2874_s6, 256, %s173_s11, [#allocation14], %s2778_s22, %s2778_s22, %s2779_s24  }
  0x7f   :  { %s2480_s23 = scalar_lea.hbm %s2889_s27, 16 }
  0x80   :  { %p2481_p4 = scmp.ne.s32.totalorder %s2889_s27, %s2480_s23  ;;  %p2484_p5 = scmp.lt.u32.totalorder %s2480_s23, %s2889_s27 }
  0x82   :  { %p2486_p6 = pnand %p2484_p5, %p2481_p4 }
  0x84   :  { %2489 = shalt.err (!%p2486_p6)
}
  0x85   :  { %s2490_s26 = scalar_lea.vmem %s198_s15, 16  ;;  %s2494_s28 = scalar_lea.vmem %s198_s15, 32 }
  0x86   :  { %p2491_p7 = scmp.ne.s32.totalorder %s198_s15, %s2490_s26  ;;  %p2495_p8 = scmp.lt.s32.totalorder %s198_s15, %s198_s15 }
  0x87   :  { %p2496_p9 = scmp.lt.s32.totalorder %s2494_s28, %s2490_s26 }
  0x89   :  { %p2497_p10 = por %p2496_p9, %p2495_p8 }
  0x8b   :  { %p2498_p11 = pnand %p2497_p10, %p2491_p7 }
  0x8d   :  { %2501 = shalt.err (!%p2498_p11)
}
  0x8e   :  { %200 = dma.hbm_to_vmem [thread:$0]  %s2889_s27, 16, %s198_s15, [#allocation17]  }
  0x8f   :  { %s2780_s6 = smov [#allocation19]   ;;  %s2781_s2 = smov [#allocation22]  }
  0x90   :  { %s220_s1 = sshll.u32 %s2780_s6, 4  ;;  %s245_s25 = sshll.u32 %s2781_s2, 4  ;;  %s221_s1 = int_to_ptr.vmem [resolvable:$true] %s220_s1  ;;  %s246_s25 = int_to_ptr.vmem [resolvable:$true] %s245_s25 }
  0x91   :  { %s2502_s7 = scalar_lea.hbm %s2909_s13, 256 }
  0x92   :  { %p2503_p12 = scmp.ne.s32.totalorder %s2909_s13, %s2502_s7  ;;  %p2506_p13 = scmp.lt.u32.totalorder %s2502_s7, %s2909_s13 }
  0x94   :  { %p2508_p0 = pnand %p2506_p13, %p2503_p12 }
  0x96   :  { %2511 = shalt.err (!%p2508_p0)
}
  0x97   :  { %s2512_s10 = scalar_lea.vmem %s221_s1, 256  ;;  %p2517_p2 = scmp.lt.s32.totalorder %s221_s1, %s221_s1 }
  0x98   :  { %p2513_p1 = scmp.ne.s32.totalorder %s221_s1, %s2512_s10  ;;  %p2518_p3 = scmp.lt.s32.totalorder %s2512_s10, %s2512_s10 }
  0x9a   :  { %p2519_p4 = por %p2518_p3, %p2517_p2 }
  0x9c   :  { %p2520_p5 = pnand %p2519_p4, %p2513_p1 }
  0x9e   :  { %2523 = shalt.err (!%p2520_p5)
}
  0x9f   :  { %226 = dma.hbm_to_vmem [thread:$0]  %s2909_s13, 256, %s221_s1, [#allocation20], %s2778_s22, %s2778_s22, %s2779_s24  }
  0xa0   :  { %s2524_s27 = scalar_lea.hbm %s2924_s20, 16 }
  0xa1   :  { %p2525_p6 = scmp.ne.s32.totalorder %s2924_s20, %s2524_s27  ;;  %p2528_p7 = scmp.lt.u32.totalorder %s2524_s27, %s2924_s20 }
  0xa3   :  { %p2530_p8 = pnand %p2528_p7, %p2525_p6 }
  0xa5   :  { %2533 = shalt.err (!%p2530_p8)
}
  0xa6   :  { %s2534_s14 = scalar_lea.vmem %s246_s25, 16  ;;  %s2538_s11 = scalar_lea.vmem %s246_s25, 32 }
  0xa7   :  { %p2535_p9 = scmp.ne.s32.totalorder %s246_s25, %s2534_s14  ;;  %p2539_p10 = scmp.lt.s32.totalorder %s246_s25, %s246_s25 }
  0xa8   :  { %p2540_p11 = scmp.lt.s32.totalorder %s2538_s11, %s2534_s14 }
  0xaa   :  { %p2541_p12 = por %p2540_p11, %p2539_p10 }
  0xac   :  { %p2542_p13 = pnand %p2541_p12, %p2535_p9 }
  0xae   :  { %2545 = shalt.err (!%p2542_p13)
}
  0xaf   :  { %248 = dma.hbm_to_vmem [thread:$0]  %s2924_s20, 16, %s246_s25, [#allocation23]  }
  0xb0   :  { %s2782_s13 = smov [#allocation2]   ;;  %s2783_s15 = smov [#allocation6]  }
  0xb1   :  { %s93_s0 = sshll.u32 %s2782_s13, 4  ;;  %s119_s16 = sshll.u32 %s2783_s15, 4  ;;  %s94_s0 = int_to_ptr.vmem [resolvable:$true] %s93_s0  ;;  %s120_s16 = int_to_ptr.vmem [resolvable:$true] %s119_s16 }
  0xb2   :  { %s2546_s18 = scalar_lea.hbm %s2824_s17, 16 }
  0xb3   :  { %p2547_p0 = scmp.ne.s32.totalorder %s2824_s17, %s2546_s18  ;;  %p2550_p1 = scmp.lt.u32.totalorder %s2546_s18, %s2824_s17 }
  0xb5   :  { %p2552_p2 = pnand %p2550_p1, %p2547_p0 }
  0xb7   :  { %2555 = shalt.err (!%p2552_p2)
}
  0xb8   :  { %s2556_s23 = scalar_lea.vmem %s94_s0, 16  ;;  %s2560_s26 = scalar_lea.vmem %s94_s0, 32 }
  0xb9   :  { %p2557_p3 = scmp.ne.s32.totalorder %s94_s0, %s2556_s23  ;;  %p2561_p4 = scmp.lt.s32.totalorder %s94_s0, %s94_s0 }
  0xba   :  { %p2562_p5 = scmp.lt.s32.totalorder %s2560_s26, %s2556_s23 }
  0xbc   :  { %p2563_p6 = por %p2562_p5, %p2561_p4 }
  0xbe   :  { %p2564_p7 = pnand %p2563_p6, %p2557_p3 }
  0xc0   :  { %2567 = shalt.err (!%p2564_p7)
}
  0xc1   :  { %96 = dma.hbm_to_vmem [thread:$0]  %s2824_s17, 16, %s94_s0, [#allocation3]  }
  0xc2   :  { %s2568_s20 = scalar_lea.hbm %s2844_s3, 16 }
  0xc3   :  { %p2569_p8 = scmp.ne.s32.totalorder %s2844_s3, %s2568_s20  ;;  %p2572_p9 = scmp.lt.u32.totalorder %s2568_s20, %s2844_s3 }
  0xc5   :  { %p2574_p10 = pnand %p2572_p9, %p2569_p8 }
  0xc7   :  { %2577 = shalt.err (!%p2574_p10)
}
  0xc8   :  { %s2578_s28 = scalar_lea.vmem %s120_s16, 16  ;;  %s2582_s6 = scalar_lea.vmem %s120_s16, 32 }
  0xc9   :  { %p2579_p11 = scmp.ne.s32.totalorder %s120_s16, %s2578_s28  ;;  %p2583_p12 = scmp.lt.s32.totalorder %s120_s16, %s120_s16 }
  0xca   :  { %p2584_p13 = scmp.lt.s32.totalorder %s2582_s6, %s2578_s28 }
  0xcc   :  { %p2585_p0 = por %p2584_p13, %p2583_p12 }
  0xce   :  { %p2586_p1 = pnand %p2585_p0, %p2579_p11 }
  0xd0   :  { %2589 = shalt.err (!%p2586_p1)
}
  0xd1   :  { %122 = dma.hbm_to_vmem [thread:$0]  %s2844_s3, 16, %s120_s16, [#allocation5]  }
  0xd2   :  { %s2784_s17 = smov [#allocation9]   ;;  %s2785_s2 = smov [#allocation12]  }
  0xd3   :  { %s140_s1 = sshll.u32 %s2784_s17, 4  ;;  %s163_s25 = sshll.u32 %s2785_s2, 4  ;;  %s141_s1 = int_to_ptr.vmem [resolvable:$true] %s140_s1  ;;  %s164_s25 = int_to_ptr.vmem [resolvable:$true] %s163_s25 }
  0xd4   :  { %s2590_s7 = scalar_lea.hbm %s2859_s19, 512 }
  0xd5   :  { %p2591_p2 = scmp.ne.s32.totalorder %s2859_s19, %s2590_s7  ;;  %p2594_p3 = scmp.lt.u32.totalorder %s2590_s7, %s2859_s19 }
  0xd7   :  { %p2596_p4 = pnand %p2594_p3, %p2591_p2 }
  0xd9   :  { %2599 = shalt.err (!%p2596_p4)
}
  0xda   :  { %s2600_s10 = scalar_lea.vmem %s141_s1, 512  ;;  %p2605_p6 = scmp.lt.s32.totalorder %s141_s1, %s141_s1 }
  0xdb   :  { %p2601_p5 = scmp.ne.s32.totalorder %s141_s1, %s2600_s10  ;;  %p2606_p7 = scmp.lt.s32.totalorder %s2600_s10, %s2600_s10 }
  0xdd   :  { %p2607_p8 = por %p2606_p7, %p2605_p6 }
  0xdf   :  { %p2608_p9 = pnand %p2607_p8, %p2601_p5 }
  0xe1   :  { %2611 = shalt.err (!%p2608_p9)
}
  0xe2   :  { %146 = dma.hbm_to_vmem [thread:$0]  %s2859_s19, 512, %s141_s1, [#allocation8], %s2778_s22, %s2778_s22, %s2779_s24  }
  0xe3   :  { %s2612_s3 = scalar_lea.hbm %s2869_s30, 128 }
  0xe4   :  { %p2613_p10 = scmp.ne.s32.totalorder %s2869_s30, %s2612_s3  ;;  %p2616_p11 = scmp.lt.u32.totalorder %s2612_s3, %s2869_s30 }
  0xe6   :  { %p2618_p12 = pnand %p2616_p11, %p2613_p10 }
  0xe8   :  { %2621 = shalt.err (!%p2618_p12)
}
  0xe9   :  { %s2622_s27 = scalar_lea.vmem %s164_s25, 128  ;;  %p2627_p0 = scmp.lt.s32.totalorder %s164_s25, %s164_s25 }
  0xea   :  { %p2623_p13 = scmp.ne.s32.totalorder %s164_s25, %s2622_s27  ;;  %p2628_p1 = scmp.lt.s32.totalorder %s2622_s27, %s2622_s27 }
  0xec   :  { %p2629_p2 = por %p2628_p1, %p2627_p0 }
  0xee   :  { %p2630_p3 = pnand %p2629_p2, %p2623_p13 }
  0xf0   :  { %2633 = shalt.err (!%p2630_p3)
}
  0xf1   :  { %166 = dma.hbm_to_vmem [thread:$0]  %s2869_s30, 128, %s164_s25, [#allocation11]  }
  0xf2   :  { %s2786_s14 = smov [#allocation15]   ;;  %s2787_s22 = smov [#allocation18]  }
  0xf3   :  { %s185_s19 = sshll.u32 %s2786_s14, 4  ;;  %s209_s11 = sshll.u32 %s2787_s22, 4  ;;  %s186_s19 = int_to_ptr.vmem [resolvable:$true] %s185_s19  ;;  %s210_s11 = int_to_ptr.vmem [resolvable:$true] %s209_s11 }
  0xf4   :  { %s2634_s13 = scalar_lea.hbm %s2879_s12, 16 }
  0xf5   :  { %p2635_p4 = scmp.ne.s32.totalorder %s2879_s12, %s2634_s13  ;;  %p2638_p5 = scmp.lt.u32.totalorder %s2634_s13, %s2879_s12 }
  0xf7   :  { %p2640_p6 = pnand %p2638_p5, %p2635_p4 }
  0xf9   :  { %2643 = shalt.err (!%p2640_p6)
}
  0xfa   :  { %s2644_s0 = scalar_lea.vmem %s186_s19, 16  ;;  %s2648_s15 = scalar_lea.vmem %s186_s19, 32 }
  0xfb   :  { %p2645_p7 = scmp.ne.s32.totalorder %s186_s19, %s2644_s0  ;;  %p2649_p8 = scmp.lt.s32.totalorder %s186_s19, %s186_s19 }
  0xfc   :  { %p2650_p9 = scmp.lt.s32.totalorder %s2648_s15, %s2644_s0 }
  0xfe   :  { %p2651_p10 = por %p2650_p9, %p2649_p8 }
 0x100   :  { %p2652_p11 = pnand %p2651_p10, %p2645_p7 }
 0x102   :  { %2655 = shalt.err (!%p2652_p11)
}
 0x103   :  { %188 = dma.hbm_to_vmem [thread:$0]  %s2879_s12, 16, %s186_s19, [#allocation14]  }
 0x104   :  { %s2656_s30 = scalar_lea.hbm %s2899_s21, 16 }
 0x105   :  { %p2657_p12 = scmp.ne.s32.totalorder %s2899_s21, %s2656_s30  ;;  %p2660_p13 = scmp.lt.u32.totalorder %s2656_s30, %s2899_s21 }
 0x107   :  { %p2662_p0 = pnand %p2660_p13, %p2657_p12 }
 0x109   :  { %2665 = shalt.err (!%p2662_p0)
}
 0x10a   :  { %s2666_s16 = scalar_lea.vmem %s210_s11, 16  ;;  %s2670_s18 = scalar_lea.vmem %s210_s11, 32 }
 0x10b   :  { %p2667_p1 = scmp.ne.s32.totalorder %s210_s11, %s2666_s16  ;;  %p2671_p2 = scmp.lt.s32.totalorder %s210_s11, %s210_s11 }
 0x10c   :  { %p2672_p3 = scmp.lt.s32.totalorder %s2670_s18, %s2666_s16 }
 0x10e   :  { %p2673_p4 = por %p2672_p3, %p2671_p2 }
 0x110   :  { %p2674_p5 = pnand %p2673_p4, %p2667_p1 }
 0x112   :  { %2677 = shalt.err (!%p2674_p5)
}
 0x113   :  { %212 = dma.hbm_to_vmem [thread:$0]  %s2899_s21, 16, %s210_s11, [#allocation17]  }
 0x114   :  { %s2788_s12 = smov [#allocation21]   ;;  %s2789_s26 = smov [#allocation24]  }
 0x115   :  { %s233_s23 = sshll.u32 %s2788_s12, 4  ;;  %s257_s20 = sshll.u32 %s2789_s26, 4  ;;  %s234_s23 = int_to_ptr.vmem [resolvable:$true] %s233_s23  ;;  %s258_s20 = int_to_ptr.vmem [resolvable:$true] %s257_s20 }
 0x116   :  { %s2678_s28 = scalar_lea.hbm %s2914_s4, 16 }
 0x117   :  { %p2679_p6 = scmp.ne.s32.totalorder %s2914_s4, %s2678_s28  ;;  %p2682_p7 = scmp.lt.u32.totalorder %s2678_s28, %s2914_s4 }
 0x119   :  { %p2684_p8 = pnand %p2682_p7, %p2679_p6 }
 0x11b   :  { %2687 = shalt.err (!%p2684_p8)
}
 0x11c   :  { %s2688_s6 = scalar_lea.vmem %s234_s23, 16  ;;  %s2692_s17 = scalar_lea.vmem %s234_s23, 32 }
 0x11d   :  { %p2689_p9 = scmp.ne.s32.totalorder %s234_s23, %s2688_s6  ;;  %p2693_p10 = scmp.lt.s32.totalorder %s234_s23, %s234_s23 }
 0x11e   :  { %p2694_p11 = scmp.lt.s32.totalorder %s2692_s17, %s2688_s6 }
 0x120   :  { %p2695_p12 = por %p2694_p11, %p2693_p10 }
 0x122   :  { %p2696_p13 = pnand %p2695_p12, %p2689_p9 }
 0x124   :  { %2699 = shalt.err (!%p2696_p13)
}
 0x125   :  { %s3332_s21 = sld [smem:[#allocation44_spill]] }
 0x126   :  { %236 = dma.hbm_to_vmem [thread:$0]  %s2914_s4, 16, %s234_s23, [#allocation20]  }
 0x12b   :  { %s2700_s1 = scalar_lea.hbm %s3332_s21, 48 }
 0x12c   :  { %p2701_p0 = scmp.ne.s32.totalorder %s3332_s21, %s2700_s1  ;;  %p2704_p1 = scmp.lt.u32.totalorder %s2700_s1, %s3332_s21 }
 0x12e   :  { %p2706_p2 = pnand %p2704_p1, %p2701_p0 }
 0x130   :  { %2709 = shalt.err (!%p2706_p2)
}
 0x131   :  { %s2710_s2 = scalar_lea.vmem %s258_s20, 48  ;;  %s2714_s25 = scalar_lea.vmem %s258_s20, 64 }
 0x132   :  { %p2711_p3 = scmp.ne.s32.totalorder %s258_s20, %s2710_s2  ;;  %p2715_p4 = scmp.lt.s32.totalorder %s258_s20, %s258_s20 }
 0x133   :  { %p2716_p5 = scmp.lt.s32.totalorder %s2714_s25, %s2710_s2 }
 0x135   :  { %p2717_p6 = por %p2716_p5, %p2715_p4 }
 0x137   :  { %p2718_p7 = pnand %p2717_p6, %p2711_p3 }
 0x139   :  { %2721 = shalt.err (!%p2718_p7)
}
 0x13a   :  { %260 = dma.hbm_to_vmem [thread:$0]  %s3332_s21, 48, %s258_s20, [#allocation23]  }
 0x13b   :  { %2722 = dma.done.wait [#allocation3], 16  }
 0x13c   :  { %2723 = vsyncadd [#allocation3], 4294967280 }
 0x13d   :  { %2724 = dma.done.wait [#allocation5], 528  }
 0x13e   :  { %2725 = vsyncadd [#allocation5], 4294966768 }
 0x13f   :  { %2726 = dma.done.wait [#allocation8], 528  }
 0x140   :  { %2727 = vsyncadd [#allocation8], 4294966768 }
 0x141   :  { %2728 = dma.done.wait [#allocation11], 144  }
 0x142   :  { %2729 = vsyncadd [#allocation11], 4294967152 }
 0x143   :  { %2730 = dma.done.wait [#allocation14], 272  }
 0x144   :  { %2731 = vsyncadd [#allocation14], 4294967024 }
 0x145   :  { %2732 = dma.done.wait [#allocation17], 32  }
 0x146   :  { %2733 = vsyncadd [#allocation17], 4294967264 }
 0x147   :  { %2734 = dma.done.wait [#allocation20], 272  }
 0x148   :  { %2735 = vsyncadd [#allocation20], 4294967024 }
 0x149   :  { %2736 = dma.done.wait [#allocation23], 64  }
 0x14a   :  { %2737 = vsyncadd [#allocation23], 4294967232  ;;  %s3333_s4 = sld [smem:[#allocation37_spill]]  ;;  %v2790_v0 = vmov 0.0|0.0   ;;  %vm2791_vm0 = vmmov 0   ;;  %v2792_v1 = vmov 0.0  }
 0x14b   :  { %2191 = vmatprep.subr.bf16.mxu0 %v2790_v0  ;;  %2066 = vmatprep.mubr.msk.f32.mxu0 %vm2791_vm0, %v2792_v1  ;;  %s3334_s7 = sld [smem:[#allocation33_spill]]  ;;  %s3335_s10 = sld [smem:[#allocation38_spill]]  ;;  %vm322_vm1 = vcmask 523264   ;;  %v1958_v21 = vld [vmem:[#allocation6] ss:$0 sm:$0xff]  ;;  %vm409_vm2 = vcmask 261120  }
 0x14c   :  { %2203 = vmatprep.subr.bf16.mxu1 %v2790_v0  ;;  %2077 = vmatprep.mubr.msk.f32.mxu1 %vm2791_vm0, %v2792_v1  ;;  %v485_v27 = vld [vmem:[#allocation9] sm:$0xff]  ;;  %v486_v28 = vld [vmem:[#allocation9 + $0x8] sm:$0xff]  ;;  %v487_v30 = vld [vmem:[#allocation9 + $0x10] sm:$0xff]  ;;  %s3336_s3 = sld [smem:[#allocation45_spill]]  ;;  %s3337_s27 = sld [smem:[#allocation34_spill]]  ;;  %vm1869_vm3 = vcmask 392192  }
 0x14d   :  { %v2210_v29 = vpack.c.bf16 %v486_v28, %v485_v27  ;;  %v488_v31 = vld [vmem:[#allocation9 + $0x18] sm:$0xff]  ;;  %v1962_v39 = vld [vmem:[#allocation10] ss:$0 sm:$0xff]  ;;  %s3338_s14 = sld [smem:[#allocation35_spill]]  ;;  %v589_v45 = vld [vmem:[#allocation12] sm:$0xff]  ;;  %s3339_s19 = sld [smem:[#allocation46_spill]] }
 0x14e   :  { %v2213_v32 = vpack.c.bf16 %v488_v31, %v487_v30  ;;  %v1960_v33 = vld [vmem:[#allocation7] ss:$0 sm:$0xff]  ;;  %s2793_s22 = smov 104   ;;  %s2794_s11 = smov 96   ;;  %vm669_vm4 = vcmask 64512   ;;  %v590_v54 = vld [vmem:[#allocation13] sm:$0xff] }
 0x14f   :  { %s3340_s13 = sld [smem:[#allocation39_spill]]  ;;  %s2795_s0 = smov 120   ;;  %v591_v55 = vld [vmem:[#allocation13 + $0x8] sm:$0xff]  ;;  %vm596_vm5 = vcmask 130048   ;;  %v945_v27 = vld [vmem:[#allocation19] sm:$0xff]  ;;  %v946_v28 = vld [vmem:[#allocation19 + $0x8] sm:$0xff] }
 0x150   :  { %v307_v2 = vld [vmem:[%s3333_s4] sm:$0xff]  ;;  %v308_v3 = vld [vmem:[%s3333_s4 + $0x8] sm:$0xff]  ;;  %v309_v4 = vld [vmem:[%s3333_s4 + $0x10] sm:$0xff]  ;;  %v2216_v56 = vpack.c.bf16 %v591_v55, %v590_v54  ;;  %s3342_s15 = sld [smem:[#allocation40_spill]]  ;;  %s3343_s30 = sld [smem:[#allocation42_spill]]  ;;  %v2243_v30 = vpack.c.bf16 %v946_v28, %v945_v27  ;;  %vm930_vm6 = vcmask 80896  }
 0x151   :  { %v2192_v5 = vpack.c.bf16 %v308_v3, %v307_v2  ;;  %v310_v6 = vld [vmem:[%s3333_s4 + $0x18] sm:$0xff]  ;;  %v311_v8 = vld [vmem:[%s3333_s4 + $0x20] sm:$0xff]  ;;  %v312_v9 = vld [vmem:[%s3333_s4 + $0x28] sm:$0xff]  ;;  %s3344_s16 = sld [smem:[#allocation41_spill]]  ;;  %s3345_s18 = sld [smem:[#allocation43_spill]]  ;;  %vm1676_vm7 = vcmask 1041408  }
 0x152   :  { %v2195_v7 = vpack.c.bf16 %v310_v6, %v309_v4  ;;  %v2198_v10 = vpack.c.bf16 %v312_v9, %v311_v8  ;;  %v313_v11 = vld [vmem:[%s3333_s4 + $0x30] sm:$0xff]  ;;  %v314_v12 = vld [vmem:[%s3333_s4 + $0x38] sm:$0xff]  ;;  %v3063_v14 = vld [vmem:[%s3334_s7] sm:$0xff]  ;;  %s3346_s12 = sld [smem:[#allocation36_spill]]  ;;  %vm2796_vm8 = vmmov 1   ;;  %s3347_s23 = sld [smem:[#allocation48_spill]] }
 0x153   :  { %2193 = vmatpush3.bf16.msra.mxu0 %v2192_v5  ;;  %v2201_v13 = vpack.c.bf16 %v314_v12, %v313_v11  ;;  %v398_v15 = vld [vmem:[%s3335_s10] sm:$0xff]  ;;  %v399_v16 = vld [vmem:[%s3335_s10 + $0x8] sm:$0xff]  ;;  %v400_v18 = vld [vmem:[%s3335_s10 + $0x10] sm:$0xff]  ;;  %s2797_s26 = smov 32   ;;  %vm1614_vm10 = vcmask 785408   ;;  %s2799_s20 = smov 24  }
 0x154   :  { %2194 = vmatprep.subr.bf16.mxu0 %v2790_v0  ;;  %v2204_v17 = vpack.c.bf16 %v399_v16, %v398_v15  ;;  %v401_v19 = vld [vmem:[%s3335_s10 + $0x18] sm:$0xff]  ;;  %v569_v47 = vld [vmem:[%s3337_s27] sm:$0xff]  ;;  %vm2294_vm9 = vmpackc.low %vm1676_vm7, %vm2796_vm8 }
 0x155   :  { %v2207_v20 = vpack.c.bf16 %v401_v19, %v400_v18  ;;  %v579_v48 = vld [vmem:[%s3338_s14] sm:$0xff]  ;;  %v753_v62 = vld [vmem:[%s3340_s13 + $0x8] sm:$0xff]  ;;  %v754_v2 = vld [vmem:[%s3340_s13 + $0x10] sm:$0xff] }
 0x156   :  { %2205 = vmatpush3.bf16.msra.mxu1 %v2204_v17  ;;  %v752_v61 = vld [vmem:[%s3340_s13] sm:$0xff]  ;;  %v755_v3 = vld [vmem:[%s3340_s13 + $0x18] sm:$0xff]  ;;  %v758_v9 = vld [vmem:[%s3340_s13 + $0x30] sm:$0xff] }
 0x157   :  { %2196 = vmatpush3.bf16.msra.mxu0 %v2195_v7  ;;  %2206 = vmatprep.subr.bf16.mxu1 %v2790_v0  ;;  %v2219_v63 = vpack.c.bf16 %v753_v62, %v752_v61  ;;  %v2222_v5 = vpack.c.bf16 %v755_v3, %v754_v2  ;;  %v756_v6 = vld [vmem:[%s3340_s13 + $0x20] sm:$0xff]  ;;  %v757_v7 = vld [vmem:[%s3340_s13 + $0x28] sm:$0xff]  ;;  %v844_v15 = vld [vmem:[%s3342_s15 + $0x10] sm:$0xff] }
 0x158   :  { %2197 = vmatprep.subr.bf16.mxu0 %v2790_v0  ;;  %v2225_v8 = vpack.c.bf16 %v757_v7, %v756_v6  ;;  %v842_v12 = vld [vmem:[%s3342_s15] sm:$0xff]  ;;  %v845_v17 = vld [vmem:[%s3342_s15 + $0x18] sm:$0xff]  ;;  %v1103_v55 = vld [vmem:[%s3343_s30 + $0x30] sm:$0xff] }
 0x159   :  { %v2234_v18 = vpack.c.bf16 %v845_v17, %v844_v15  ;;  %v846_v19 = vld [vmem:[%s3342_s15 + $0x20] sm:$0xff]  ;;  %v1973_v62 = vld [vmem:[#allocation21] ss:$0 sm:$0xff]  ;;  %v1188_v7 = vld [vmem:[%s3345_s18 + $0x8] sm:$0xff] }
 0x15a   :  { %2208 = vmatpush3.bf16.msra.mxu1 %v2207_v20  ;;  %v847_v20 = vld [vmem:[%s3342_s15 + $0x28] sm:$0xff]  ;;  %v1194_v17 = vld [vmem:[%s3345_s18 + $0x38] sm:$0xff]  ;;  %v1203_v27 = vld [vmem:[%s3345_s18 + $0x80] sm:$0xff] }
 0x15b   :  { %2199 = vmatpush3.bf16.msra.mxu0 %v2198_v10  ;;  %2209 = vmatprep.subr.bf16.mxu1 %v2790_v0  ;;  %v759_v10 = vld [vmem:[%s3340_s13 + $0x38] sm:$0xff] }
 0x15c   :  { %2200 = vmatprep.subr.bf16.mxu0 %v2790_v0  ;;  %v2228_v11 = vpack.c.bf16 %v759_v10, %v758_v9  ;;  %v1187_v9 = vld [vmem:[%s3345_s18] sm:$0xff] }
 0x15f   :  { %2202 = vmatpush3.bf16.msra.mxu0 %v2201_v13  ;;  %v843_v13 = vld [vmem:[%s3342_s15 + $0x8] sm:$0xff] }
 0x160   :  { %2215 = vmatprep.subr.bf16.mxu0 %v2790_v0  ;;  %v2231_v16 = vpack.c.bf16 %v843_v13, %v842_v12  ;;  %v1189_v12 = vld [vmem:[%s3345_s18 + $0x10] sm:$0xff]  ;;  %v1192_v13 = vld [vmem:[%s3345_s18 + $0x28] sm:$0xff] }
 0x162   :  { %2067 = vmatmul.mubr.msk.f32.vlgmr.msra.gmra.mrb[0].mxu0 %vm322_vm1, %v3063_v14 }
 0x163   :  { %2095 = vmatprep.mubr.msk.f32.mxu0 %vm2791_vm0, %v2792_v1  ;;  %2217 = vmatpush3.bf16.msra.mxu0 %v2216_v56  ;;  %v1104_v56 = vld [vmem:[%s3343_s30 + $0x38] sm:$0xff] }
 0x164   :  { %2218 = vmatprep.subr.bf16.mxu0 %v2790_v0 }
 0x235   :  { %v392_v22 = vpop.f32.mrb[0].mxu0 }
 0x236   :  { %v393_v23 = vadd.f32 %v1958_v21, %v392_v22  ;;  %v2068_v24 = vpop.f32.mrb[1].mxu0  ;;  %v2237_v21 = vpack.c.bf16 %v847_v20, %v846_v19  ;;  %v1966_v22 = vld [vmem:[#allocation15] ss:$0 sm:$0xff]  ;;  %v1193_v19 = vld [vmem:[%s3345_s18 + $0x30] sm:$0xff] }
 0x238   :  { %v396_v25 = vmul.f32 0.01, %v393_v23 }
 0x23a   :  { %v397_v26 = vmax.f32 %v393_v23, %v396_v25 }
 0x23c   :  { %2078 = vmatmul.mubr.msk.f32.vlgmr.msra.gmra.mrb[0].mxu1 %vm409_vm2, %v397_v26 }
 0x23d   :  { %2088 = vmatprep.mubr.msk.f32.mxu1 %vm2791_vm0, %v2792_v1  ;;  %2211 = vmatpush3.bf16.msra.mxu1 %v2210_v29 }
 0x23e   :  { %2212 = vmatprep.subr.bf16.mxu1 %v2790_v0 }
 0x241   :  { %2214 = vmatpush3.bf16.msra.mxu1 %v2213_v32  ;;  %v848_v32 = vld [vmem:[%s3342_s15 + $0x30] sm:$0xff] }
 0x242   :  { %2098 = vmatprep.subr.mxu1 %v2792_v1 }
 0x30f   :  { %v479_v34 = vpop.f32.mrb[0].mxu1 }
 0x310   :  { %v480_v35 = vadd.f32 %v1960_v33, %v479_v34  ;;  %v2079_v36 = vpop.f32.mrb[1].mxu1  ;;  %v849_v33 = vld [vmem:[%s3342_s15 + $0x38] sm:$0xff] }
 0x311   :  { %v2240_v34 = vpack.c.bf16 %v849_v33, %v848_v32  ;;  %v1098_v36 = vld [vmem:[%s3343_s30 + $0x8] sm:$0xff] }
 0x312   :  { %v483_v37 = vmul.f32 0.01, %v480_v35  ;;  %v1204_v33 = vld [vmem:[%s3345_s18 + $0x88] sm:$0xff] }
 0x314   :  { %v484_v38 = vmax.f32 %v480_v35, %v483_v37  ;;  %v1097_v35 = vld [vmem:[%s3343_s30] sm:$0xff] }
 0x315   :  { %v2246_v37 = vpack.c.bf16 %v1098_v36, %v1097_v35  ;;  %v1206_v35 = vld [vmem:[%s3345_s18 + $0x98] sm:$0xff]  ;;  %v1209_v36 = vld [vmem:[%s3345_s18 + $0xb0] sm:$0xff] }
 0x316   :  { %2089 = vmatmul.mubr.msk.f32.vlgmr.msra.gmra.mrb[2].mxu1 %vm409_vm2, %v484_v38  ;;  %v1967_v38 = vld [vmem:[#allocation16] ss:$0 sm:$0xff] }
 0x317   :  { %2100 = vmatprep.mubr.msk.f32.mxu1 %vm2791_vm0, %v2792_v1  ;;  %2099 = vmatpush3.msra.mxu1 %v589_v45 }
 0x318   :  { %2230 = vmatprep.subr.bf16.mxu1 %v2790_v0 }
 0x3e9   :  { %v565_v40 = vpop.f32.mrb[2].mxu1 }
 0x3ea   :  { %v3084_v41 = vadd.f32 %v1962_v39, %v565_v40  ;;  %v2090_v42 = vpop.f32.mrb[3].mxu1 }
 0x3ec   :  { %1870 = vst.msk [vmem:[%s3336_s3] sm:$0xff] %vm1869_vm3, %v3084_v41  ;;  %v570_v43 = vmul.f32 0.5, %v3084_v41 }
 0x3ee   :  { %v571_v44 = vmul.f32 1.442695, %v570_v43 }
 0x3f0   :  { %2362 = vpow2.f32 %v571_v44 }
 0x3fa   :  { %v2363_v46 = vpop.eup %2362 }
 0x3fb   :  { %574 = vrot.lane.b32.xlu1 %v2363_v46, %s2793_s22  ;;  %580 = vrot.lane.b32.xlu0 %v2363_v46, %s2794_s11 }
 0x46d   :  { %v575_v49 = vpop.permute.xlu1 %574  ;;  %v581_v50 = vpop.permute.xlu0 %580 }
 0x46e   :  { %v577_v51 = vmul.f32 %v575_v49, %v569_v47  ;;  %v583_v52 = vmul.f32 %v581_v50, %v579_v48  ;;  %v944_v47 = vld [vmem:[%s3344_s16] sm:$0xff]  ;;  %v1099_v48 = vld [vmem:[%s3343_s30 + $0x10] sm:$0xff]  ;;  %v1100_v49 = vld [vmem:[%s3343_s30 + $0x18] sm:$0xff] }
 0x46f   :  { %v2249_v50 = vpack.c.bf16 %v1100_v49, %v1099_v48 }
 0x470   :  { %v3095_v53 = vadd.f32 %v577_v51, %v3084_v41  ;;  %585 = vrot.lane.b32.xlu0 %v583_v52, %s2779_s24  ;;  %s3341_s24 = sld [smem:[#allocation47_spill]]  ;;  %v1101_v51 = vld [vmem:[%s3343_s30 + $0x20] sm:$0xff]  ;;  %v1102_v52 = vld [vmem:[%s3343_s30 + $0x28] sm:$0xff] }
 0x471   :  { %v2252_v54 = vpack.c.bf16 %v1102_v52, %v1101_v51 }
 0x472   :  { %2101 = vmatmul.mubr.msk.f32.vlgmr.msra.gmra.mrb[4].mxu1 %vm669_vm4, %v3095_v53  ;;  %1871 = vst.msk [vmem:[%s3339_s19] sm:$0xff] %vm669_vm4, %v3095_v53 }
 0x473   :  { %2138 = vmatprep.mubr.msk.f32.mxu1 %vm2791_vm0, %v2792_v1  ;;  %2232 = vmatpush3.bf16.msra.mxu1 %v2231_v16  ;;  %v2274_v16 = vpack.c.bf16 %v1192_v13, %v1189_v12 }
 0x474   :  { %1446 = vrot.lane.b32.xlu0 %v3084_v41, %s2795_s0  ;;  %2233 = vmatprep.subr.bf16.mxu1 %v2790_v0 }
 0x477   :  { %2235 = vmatpush3.bf16.msra.mxu1 %v2234_v18  ;;  %v1197_v18 = vld [vmem:[%s3345_s18 + $0x50] sm:$0xff] }
 0x478   :  { %2236 = vmatprep.subr.bf16.mxu1 %v2790_v0  ;;  %v2261_v20 = vpack.c.bf16 %v1197_v18, %v1194_v17  ;;  %v1213_v18 = vlaneseq }
 0x47b   :  { %2238 = vmatpush3.bf16.msra.mxu1 %v2237_v21  ;;  %v1196_v21 = vld [vmem:[%s3345_s18 + $0x48] sm:$0xff] }
 0x47c   :  { %2239 = vmatprep.subr.bf16.mxu1 %v2790_v0 }
 0x47f   :  { %2241 = vmatpush3.bf16.msra.mxu1 %v2240_v34 }
 0x480   :  { %2148 = vmatprep.subr.mxu1 %v2792_v1 }
 0x4e2   :  { %v586_v57 = vpop.permute.xlu0 %585 }
 0x4e3   :  { %v588_v58 = vadd.f32 %v586_v57, %v3084_v41  ;;  %v2255_v57 = vpack.c.bf16 %v1104_v56, %v1103_v55 }
 0x4e5   :  { %594 = vrot.lane.b32.xlu1 %v588_v58, %s2795_s0 }
 0x4e6   :  { %v1447_v48 = vpop.permute.xlu0 %1446 }
 0x4e9   :  { %1521 = vrot.lane.b32.xlu1 %v3084_v41, %s2794_s11 }
 0x545   :  { %v739_v59 = vpop.f32.mrb[4].mxu1 }
 0x546   :  { %v2102_v60 = vpop.f32.mrb[5].mxu1 }
 0x557   :  { %v595_v4 = vpop.permute.xlu1 %594 }
 0x558   :  { %1873 = vst.msk [vmem:[%s3341_s24] sm:$0xff] %vm596_vm5, %v595_v4  ;;  %2096 = vmatmul.mubr.msk.f32.vlgmr.msra.gmra.mrb[2].mxu0 %vm596_vm5, %v595_v4 }
 0x559   :  { %2220 = vmatpush3.bf16.msra.mxu0 %v2219_v63  ;;  %2119 = vmatprep.mubr.msk.f32.mxu0 %vm2791_vm0, %v2792_v1 }
 0x55a   :  { %2221 = vmatprep.subr.bf16.mxu0 %v2790_v0 }
 0x55d   :  { %2223 = vmatpush3.bf16.msra.mxu0 %v2222_v5 }
 0x55e   :  { %2224 = vmatprep.subr.bf16.mxu0 %v2790_v0 }
 0x561   :  { %2226 = vmatpush3.bf16.msra.mxu0 %v2225_v8  ;;  %v1191_v8 = vld [vmem:[%s3345_s18 + $0x20] sm:$0xff] }
 0x562   :  { %2227 = vmatprep.subr.bf16.mxu0 %v2790_v0  ;;  %v2257_v10 = vpack.c.bf16 %v1191_v8, %v1188_v7  ;;  %v1522_v7 = vpop.permute.xlu1 %1521 }
 0x565   :  { %2229 = vmatpush3.bf16.msra.mxu0 %v2228_v11  ;;  %v1190_v11 = vld [vmem:[%s3345_s18 + $0x18] sm:$0xff] }
 0x566   :  { %2242 = vmatprep.subr.bf16.mxu0 %v2790_v0  ;;  %v2259_v15 = vpack.c.bf16 %v1190_v11, %v1187_v9 }
 0x62b   :  { %v665_v23 = vpop.f32.mrb[2].mxu0 }
 0x62c   :  { %v740_v24 = vadd.f32 %v739_v59, %v665_v23  ;;  %v2097_v25 = vpop.f32.mrb[3].mxu0  ;;  %v1198_v23 = vld [vmem:[%s3345_s18 + $0x58] sm:$0xff] }
 0x62e   :  { %v749_v26 = vadd.f32 %v1966_v22, %v740_v24  ;;  %v1195_v22 = vld [vmem:[%s3345_s18 + $0x40] sm:$0xff]  ;;  %v2263_v24 = vpack.c.bf16 %v1196_v21, %v1193_v19  ;;  %v3227_v19 = vshrl.u32 %v1213_v18, 7 }
 0x62f   :  { %v2277_v25 = vpack.c.bf16 %v1198_v23, %v1195_v22  ;;  %v1211_v22 = vld [vmem:[#allocation24] sm:$0x7] }
 0x630   :  { %v750_v29 = vmul.f32 0.01, %v749_v26  ;;  %v1223_v21 = vsub.s32 2, %v3227_v19  ;;  %v1219_v23 = vsub.s32 1, %v3227_v19  ;;  %vm1785_vm11 = vcmp.lt.s32.totalorder %v3227_v19, 2 }
 0x632   :  { %v751_v31 = vmax.f32 %v749_v26, %v750_v29  ;;  %v1200_v26 = vld [vmem:[%s3345_s18 + $0x68] sm:$0xff]  ;;  %v1199_v29 = vld [vmem:[%s3345_s18 + $0x60] sm:$0xff] }
 0x633   :  { %v2265_v28 = vpack.c.bf16 %v1203_v27, %v1200_v26  ;;  %v1220_v26 = vrot.slane %v1211_v22, %v1219_v23 }
 0x634   :  { %2120 = vmatmul.mubr.msk.f32.vlgmr.msra.gmra.mrb[4].mxu0 %vm322_vm1, %v751_v31  ;;  %v1201_v31 = vld [vmem:[%s3345_s18 + $0x70] sm:$0xff] }
 0x635   :  { %2244 = vmatpush3.bf16.msra.mxu0 %v2243_v30  ;;  %2145 = vmatprep.mubr.msk.f32.mxu0 %vm2791_vm0, %v2792_v1  ;;  %v1202_v30 = vld [vmem:[%s3345_s18 + $0x78] sm:$0xff]  ;;  %v2280_v34 = vpack.c.bf16 %v1204_v33, %v1201_v31 }
 0x636   :  { %2245 = vmatprep.subr.bf16.mxu0 %v2790_v0  ;;  %v2267_v32 = vpack.c.bf16 %v1202_v30, %v1199_v29 }
 0x638   :  { %2146 = vmatmul.mubr.msk.f32.vlgmr.msra.gmra.mrb[6].mxu0 %vm596_vm5, %v595_v4 }
 0x639   :  { %2169 = vmatprep.mubr.msk.f32.mxu0 %vm2791_vm0, %v2792_v1  ;;  %2247 = vmatpush3.bf16.msra.mxu0 %v2246_v37  ;;  %v2269_v37 = vpack.c.bf16 %v1209_v36, %v1206_v35 }
 0x63a   :  { %2248 = vmatprep.subr.bf16.mxu0 %v2790_v0 }
 0x63d   :  { %2250 = vmatpush3.bf16.msra.mxu0 %v2249_v50 }
 0x63e   :  { %2251 = vmatprep.subr.bf16.mxu0 %v2790_v0 }
 0x641   :  { %2253 = vmatpush3.bf16.msra.mxu0 %v2252_v54  ;;  %v1974_v54 = vld [vmem:[#allocation22] ss:$0 sm:$0xff] }
 0x642   :  { %2254 = vmatprep.subr.bf16.mxu0 %v2790_v0 }
 0x645   :  { %2256 = vmatpush3.bf16.msra.mxu0 %v2255_v57 }
 0x646   :  { %2273 = vmatprep.subr.bf16.mxu0 %v2790_v0 }
 0x707   :  { %v836_v39 = vpop.f32.mrb[4].mxu0 }
 0x708   :  { %v837_v40 = vadd.f32 %v1967_v38, %v836_v39  ;;  %v2121_v42 = vpop.f32.mrb[5].mxu0  ;;  %v1205_v38 = vld [vmem:[%s3345_s18 + $0x90] sm:$0xff]  ;;  %v1208_v39 = vld [vmem:[%s3345_s18 + $0xa8] sm:$0xff] }
 0x709   :  { %v2271_v42 = vpack.c.bf16 %v1208_v39, %v1205_v38 }
 0x70a   :  { %v840_v43 = vmul.f32 0.01, %v837_v40 }
 0x70b   :  { %v1014_v44 = vpop.f32.mrb[6].mxu0 }
 0x70c   :  { %v841_v45 = vmax.f32 %v837_v40, %v840_v43  ;;  %v2147_v46 = vpop.f32.mrb[7].mxu0  ;;  %v1207_v40 = vld [vmem:[%s3345_s18 + $0xa0] sm:$0xff]  ;;  %v1210_v43 = vld [vmem:[%s3345_s18 + $0xb8] sm:$0xff] }
 0x70d   :  { %v1444_v46 = vld [vmem:[#allocation4 + $0x18] sm:$0xff] }
 0x70e   :  { %2139 = vmatmul.mubr.msk.f32.vlgmr.msra.gmra.mrb[6].mxu1 %vm322_vm1, %v841_v45  ;;  %v1442_v45 = vld [vmem:[#allocation4 + $0x8] sm:$0xff] }
 0x70f   :  { %2149 = vmatpush3.msra.mxu1 %v944_v47  ;;  %2150 = vmatprep.mubr.msk.f32.mxu1 %vm2791_vm0, %v2792_v1  ;;  %v2285_v47 = vpack.c.bf16 %v1444_v46, %v1442_v45 }
 0x710   :  { %2258 = vmatprep.subr.bf16.mxu1 %v2257_v10 }
 0x712   :  { %2151 = vmatmul.mubr.msk.f32.vlgmr.msra.gmra.mrb[8].mxu1 %vm669_vm4, %v3095_v53  ;;  %v1969_v53 = vld [vmem:[#allocation18] ss:$0 sm:$0xff] }
 0x713   :  { %1295 = vmatprep.mubr.f32.mxu1 %v2792_v1  ;;  %2260 = vmatpush1.bf16.msra.mxu1 %v2259_v15 }
 0x714   :  { %2262 = vmatprep.subr.bf16.mxu1 %v2261_v20  ;;  %v3230_v20 = vsub.s32 0, %v3227_v19 }
 0x717   :  { %2264 = vmatpush1.bf16.msra.mxu1 %v2263_v24  ;;  %v1216_v24 = vrot.slane %v1211_v22, %v3230_v20 }
 0x718   :  { %2266 = vmatprep.subr.bf16.mxu1 %v2265_v28 }
 0x71b   :  { %2268 = vmatpush1.bf16.msra.mxu1 %v2267_v32 }
 0x71c   :  { %2270 = vmatprep.subr.bf16.mxu1 %v2269_v37 }
 0x71f   :  { %2272 = vmatpush1.bf16.msra.mxu1 %v2271_v42 }
 0x720   :  { %2286 = vmatprep.subr.bf16.mxu1 %v2285_v47 }
 0x7e1   :  { %v926_v58 = vpop.f32.mrb[6].mxu1 }
 0x7e2   :  { %v3165_v59 = vadd.f32 %v1969_v53, %v926_v58  ;;  %v2140_v60 = vpop.f32.mrb[7].mxu1  ;;  %v1441_v53 = vld [vmem:[#allocation4] sm:$0xff]  ;;  %v1443_v58 = vld [vmem:[#allocation4 + $0x10] sm:$0xff] }
 0x7e4   :  { %v931_v61 = vsel %vm930_vm6, %v3165_v59, -inf }
 0x7e5   :  { %932 = vmax.xlane.f32.xlu0 %v931_v61  ;;  %v1084_v63 = vpop.f32.mrb[8].mxu1  ;;  %v2287_v61 = vpack.c.bf16 %v1443_v58, %v1441_v53 }
 0x7e6   :  { %v1085_v2 = vadd.f32 %v1084_v63, %v1014_v44  ;;  %v2152_v3 = vpop.f32.mrb[9].mxu1  ;;  %v2283_v44 = vpack.c.bf16 %v1210_v43, %v1207_v40  ;;  %v1670_v63 = vld [vmem:[%s3346_s12 + $0x8] sm:$0xff] }
 0x7e8   :  { %v1094_v4 = vadd.f32 %v1973_v62, %v1085_v2  ;;  %v1672_v2 = vld [vmem:[%s3346_s12 + $0x18] sm:$0x3] }
 0x7e9   :  { %v2293_v3 = vpack.c.bf16 %v1672_v2, %v1670_v63 }
 0x7ea   :  { %v1095_v5 = vmul.f32 0.01, %v1094_v4 }
 0x7ec   :  { %v1096_v6 = vmax.f32 %v1094_v4, %v1095_v5  ;;  %v1669_v4 = vld [vmem:[%s3346_s12] sm:$0xff]  ;;  %v1671_v5 = vld [vmem:[%s3346_s12 + $0x10] sm:$0x3] }
 0x7ee   :  { %2170 = vmatmul.mubr.msk.f32.vlgmr.msra.gmra.mrb[8].mxu0 %vm322_vm1, %v1096_v6  ;;  %v2296_v6 = vpack.c.bf16 %v1671_v5, %v1669_v4 }
 0x7ef   :  { %2188 = vmatprep.mubr.msk.f32.mxu0 %vm2791_vm0, %v2792_v1  ;;  %2275 = vmatpush3.bf16.msra.mxu0 %v2274_v16 }
 0x7f0   :  { %2276 = vmatprep.subr.bf16.mxu0 %v2790_v0 }
 0x7f3   :  { %2278 = vmatpush3.bf16.msra.mxu0 %v2277_v25  ;;  %v1224_v25 = vrot.slane %v1211_v22, %v1223_v21 }
 0x7f4   :  { %2279 = vmatprep.subr.bf16.mxu0 %v2790_v0 }
 0x7f7   :  { %2281 = vmatpush3.bf16.msra.mxu0 %v2280_v34 }
 0x7f8   :  { %2282 = vmatprep.subr.bf16.mxu0 %v2790_v0 }
 0x7fb   :  { %2284 = vmatpush3.bf16.msra.mxu0 %v2283_v44 }
 0x872   :  { %v933_v49 = vpop.xlane.xlu0 %932 }
 0x873   :  { %v934_v50 = vsub.f32 %v3165_v59, %v933_v49 }
 0x875   :  { %v935_v51 = vmul.f32 1.442695, %v934_v50 }
 0x877   :  { %2364 = vpow2.f32 %v935_v51 }
 0x881   :  { %v2365_v52 = vpop.eup %2364 }
 0x882   :  { %v937_v0 = vsel %vm930_vm6, %v2365_v52, 0.0 }
 0x883   :  { %938 = vadd.xlane.f32.xlu1 %v937_v0 }
 0x8c1   :  { %v1181_v55 = vpop.f32.mrb[8].mxu0 }
 0x8c2   :  { %v1182_v56 = vadd.f32 %v1974_v54, %v1181_v55  ;;  %v2171_v57 = vpop.f32.mrb[9].mxu0 }
 0x8c4   :  { %v1185_v60 = vmul.f32 0.01, %v1182_v56 }
 0x8c6   :  { %v1186_v62 = vmax.f32 %v1182_v56, %v1185_v60  ;;  %v1372_v56 = vld [vmem:[#allocation2] sm:$0x1] }
 0x8c8   :  { %1976 = vmatmul.mubr.msk.f32.vlgmr.msra.gmra.mrb[10].mxu1 %vm322_vm1, %v1186_v62  ;;  %2189 = vmatmul.mubr.msk.f32.vlgmr.msra.gmra.mrb[10].mxu0 %vm322_vm1, %v1186_v62 }
 0x8c9   :  { %2288 = vmatpush1.bf16.msra.mxu1 %v2287_v61  ;;  %1514 = vmatprep.mubr.f32.mxu1 %v2792_v1 }
 0x8ca   :  { %2290 = vmatprep.subr.bf16.mxu1 %v2285_v47 }
 0x8cc   :  { %1979 = vmatmul.mubr.msk.f32.vlgmr.msra.gmra.mrb[12].mxu1 %vm596_vm5, %v1447_v48 }
 0x8cd   :  { %2292 = vmatpush1.bf16.msra.mxu1 %v2287_v61  ;;  %1589 = vmatprep.mubr.f32.mxu1 %v2792_v1  ;;  %v1978_v61 = vadd.f32 8.0, %v1372_v56 }
 0x8ce   :  { %2295 = vmatprep.subr.msk.bf16.mxu1 %vm2294_vm9, %v2293_v3 }
 0x8cf   :  { %v1375_v5 = vand.u32 2147483647, %v1978_v61 }
 0x8d0   :  { %1980 = vmatmul.mubr.msk.f32.vlgmr.msra.gmra.mrb[14].mxu1 %vm596_vm5, %v1522_v7 }
 0x8d1   :  { %2298 = vmatpush1.bf16.msk.msra.mxu1 %vm2294_vm9, %v2296_v6  ;;  %1747 = vmatprep.mubr.f32.mxu1 %v2792_v1  ;;  %v1424_v6 = vmul.f32 %v3084_v41, %v3084_v41  ;;  %v1376_v7 = vsub.f32 0.0, %v1375_v5 }
 0x910   :  { %v939_v8 = vpop.xlane.xlu1 %938 }
 0x911   :  { %2366 = vrcp.f32 %v939_v8  ;;  %v1377_v8 = vmul.f32 1.442695, %v1376_v7 }
 0x91b   :  { %v2367_v9 = vpop.eup %2366 }
 0x91c   :  { %v941_v10 = vmul.f32 %v2367_v9, %v2365_v52 }
 0x91e   :  { %v942_v11 = vmul.f32 0.999999, %v941_v10 }
 0x920   :  { %v3212_v12 = vadd.f32 1e-07, %v942_v11 }
 0x922   :  { %1874 = vst.msk [vmem:[%s3347_s23] sm:$0xff] %vm930_vm6, %v3212_v12  ;;  %1983 = vmatmul.mubr.msk.f32.vlgmr.msra.gmra.mrb[16].mxu1 %vm930_vm6, %v3212_v12  ;;  %2368 = vlog2.f32 %v3212_v12 }
 0x92c   :  { %v2369_v13 = vpop.eup %2368 }
 0x92d   :  { %v3220_v15 = vmul.f32 0.6931472, %v2369_v13  ;;  %v1374_v13 = vmax.f32 %v1978_v61, 0.0 }
 0x92f   :  { %v1775_v16 = vadd.f32 2.3025851, %v3220_v15 }
 0x931   :  { %v3224_v17 = vmul.f32 %v1775_v16, %v3212_v12 }
 0x99b   :  { %v1297_v27 = vpop.f32.mrb[10].mxu1  ;;  %v1368_v28 = vpop.f32.mrb[10].mxu0 }
 0x99c   :  { %v1298_v29 = vadd.f32 %v1297_v27, %v1216_v24  ;;  %v3235_v30 = vadd.f32 %v1368_v28, %v1224_v25  ;;  %v1299_v31 = vpop.f32.mrb[11].mxu1  ;;  %v2190_v32 = vpop.f32.mrb[11].mxu0 }
 0x99d   :  { %v3237_v33 = vadd.f32 %v1299_v31, %v1220_v26 }
 0x99e   :  { %1881 = vst [vmem:[%s2969_s8] sm:$0xff] %v1298_v29  ;;  %v1640_v34 = vsub.f32 0.0, %v3235_v30  ;;  %1883 = vst.msk [vmem:[%s2969_s8 + $0x10] sm:$0xff] %vm322_vm1, %v3235_v30  ;;  %1612 = vrot.lane.b32.xlu1 %v3235_v30, %s2794_s11 }
 0x99f   :  { %v1639_v35 = vsub.f32 0.0, %v3237_v33  ;;  %1882 = vst [vmem:[%s2969_s8 + $0x8] sm:$0xff] %v3237_v33  ;;  %v1516_v36 = vpop.f32.mrb[12].mxu1  ;;  %1610 = vrot.lane.b32.xlu0 %v3237_v33, %s2794_s11  ;;  %s2798_s8 = smov 64  }
 0x9a0   :  { %v1643_v37 = vmul.f32 1.442695, %v1640_v34  ;;  %v1635_v38 = vsub.f32 %v1298_v29, %v1516_v36  ;;  %v1518_v39 = vpop.f32.mrb[13].mxu1 }
 0x9a1   :  { %v1641_v40 = vmul.f32 1.442695, %v1639_v35  ;;  %v1636_v55 = vsub.f32 %v3237_v33, %v1518_v39  ;;  %v1430_v39 = vmul.f32 1.442695, %v3084_v41 }
 0x9a2   :  { %2370 = vpow2.f32 %v1643_v37  ;;  %v1637_v2 = vmul.f32 %v1635_v38, %v1635_v38 }
 0x9a3   :  { %2372 = vpow2.f32 %v1641_v40  ;;  %v1591_v42 = vpop.f32.mrb[14].mxu1  ;;  %v1638_v58 = vmul.f32 %v1636_v55, %v1636_v55 }
 0x9a4   :  { %v1593_v43 = vpop.f32.mrb[15].mxu1 }
 0x9ac   :  { %v2371_v44 = vpop.eup %2370 }
 0x9ad   :  { %v2373_v45 = vpop.eup %2372  ;;  %1649 = vrot.lane.b32.xlu1 %v2371_v44, %s2794_s11 }
 0x9ae   :  { %1647 = vrot.lane.b32.xlu0 %v2373_v45, %s2794_s11 }
 0x9b1   :  { %1600 = vrot.lane.b32.xlu1 %v1593_v43, %s2797_s26 }
 0x9b2   :  { %1598 = vrot.lane.b32.xlu0 %v1591_v42, %s2797_s26 }
 0x9f5   :  { %v3255_v46 = vpop.f32.mrb[16].mxu1 }
 0x9f6   :  { %v3257_v47 = vpop.f32.mrb[17].mxu1 }
 0xa10   :  { %v1613_v48 = vpop.permute.xlu1 %1612 }
 0xa11   :  { %v1619_v49 = vsub.f32 %v1593_v43, %v1613_v48  ;;  %v1611_v50 = vpop.permute.xlu0 %1610 }
 0xa12   :  { %v1615_v51 = vsel %vm1614_vm10, %v1611_v50, %v1613_v48 }
 0xa13   :  { %v1622_v52 = vmul.f32 1.442695, %v1619_v49  ;;  %v1618_v0 = vsub.f32 %v1591_v42, %v1615_v51 }
 0xa15   :  { %2374 = vpow2.f32 %v1622_v52  ;;  %v1620_v54 = vmul.f32 1.442695, %v1618_v0 }
 0xa17   :  { %2376 = vpow2.f32 %v1620_v54 }
 0xa18   :  { %2378 = vpow2.f32 %v1377_v8 }
 0xa1f   :  { %v2375_v57 = vpop.eup %2374  ;;  %v1650_v53 = vpop.permute.xlu1 %1649 }
 0xa20   :  { %v1648_v60 = vpop.permute.xlu0 %1647  ;;  %1628 = vrot.lane.b32.xlu1 %v2375_v57, %s2797_s26  ;;  %v1655_v3 = vmul.f32 %v1650_v53, %v1638_v58  ;;  %v1423_v58 = vadd.f32 1.0, %v3084_v41 }
 0xa21   :  { %v2377_v62 = vpop.eup %2376  ;;  %v1651_v63 = vsel %vm1614_vm10, %v1648_v60, %v1650_v53 }
 0xa22   :  { %1626 = vrot.lane.b32.xlu0 %v2377_v62, %s2797_s26  ;;  %v1654_v4 = vmul.f32 %v1651_v63, %v1637_v2  ;;  %v2379_v9 = vpop.eup %2378 }
 0xa23   :  { %v1379_v10 = vadd.f32 1.0, %v2379_v9  ;;  %v1601_v34 = vpop.permute.xlu1 %1600 }
 0xa24   :  { %1660 = vrot.lane.b32.xlu1 %v1655_v3, %s2797_s26  ;;  %v1599_v35 = vpop.permute.xlu0 %1598 }
 0xa25   :  { %2380 = vlog2.f32 %v1379_v10  ;;  %v1602_v37 = vsel %vm409_vm2, %v1599_v35, %v1601_v34  ;;  %v1605_v40 = vsub.f32 %v3237_v33, %v1599_v35 }
 0xa26   :  { %1658 = vrot.lane.b32.xlu0 %v1654_v4, %s2797_s26  ;;  %v1606_v42 = vsub.f32 %v3235_v30, %v1602_v37 }
 0xa27   :  { %v1607_v48 = vadd.f32 -1.0, %v1605_v40  ;;  %v1777_v40 = vsel %vm930_vm6, %v3224_v17, 0.0 }
 0xa28   :  { %1396 = vrot.lane.b32.xlu1 %v3235_v30, %s2798_s8  ;;  %v1608_v50 = vadd.f32 -1.0, %v1606_v42 }
 0xa2a   :  { %1426 = vrot.lane.b32.xlu0 %v1424_v6, %s2799_s20 }
 0xa2f   :  { %v2381_v11 = vpop.eup %2380 }
 0xa30   :  { %v1381_v16 = vmul.f32 0.6931472, %v2381_v11 }
 0xa32   :  { %v1382_v21 = vadd.f32 %v1381_v16, %v1374_v13  ;;  %v1780_v16 = vsel %vm930_vm6, %v3212_v12, -inf }
 0xa34   :  { %v1383_v22 = vadd.f32 -8.0, %v1382_v21  ;;  %v1771_v21 = vmul.f32 %v3220_v15, %v3212_v12 }
 0xa36   :  { %v1384_v23 = vsub.f32 8.0, %v1383_v22  ;;  %v1772_v22 = vsel %vm930_vm6, %v1771_v21, 0.0 }
 0xa38   :  { %v1386_v24 = vand.u32 2147483647, %v1384_v23  ;;  %v1385_v31 = vmax.f32 %v1384_v23, 0.0 }
 0xa3a   :  { %v1387_v25 = vsub.f32 0.0, %v1386_v24 }
 0xa3c   :  { %v1388_v26 = vmul.f32 1.442695, %v1387_v25 }
 0xa3e   :  { %2382 = vpow2.f32 %v1388_v26 }
 0xa48   :  { %v2383_v27 = vpop.eup %2382 }
 0xa49   :  { %v1390_v28 = vadd.f32 1.0, %v2383_v27 }
 0xa4b   :  { %2384 = vlog2.f32 %v1390_v28 }
 0xa4c   :  { %2386 = vpow2.f32 %v1430_v39 }
 0xa55   :  { %v2385_v29 = vpop.eup %2384 }
 0xa56   :  { %v1392_v32 = vmul.f32 0.6931472, %v2385_v29  ;;  %v2387_v63 = vpop.eup %2386 }
 0xa58   :  { %v1393_v36 = vadd.f32 %v1392_v32, %v1385_v31 }
 0xa5a   :  { %v1394_v38 = vsub.f32 8.0, %v1393_v36 }
 0xa5c   :  { %v1400_v45 = vsub.f32 0.0, %v1394_v38  ;;  %v1416_v9 = vrot.slane %v1394_v38, %v3230_v20 }
 0xa5e   :  { %v1401_v55 = vmul.f32 1.442695, %v1400_v45 }
 0xa60   :  { %2388 = vpow2.f32 %v1401_v55 }
 0xa6a   :  { %v2389_v4 = vpop.eup %2388 }
 0xa6b   :  { %v1407_v5 = vrot.slane %v2389_v4, %v3230_v20 }
 0xa92   :  { %v1629_v43 = vpop.permute.xlu1 %1628 }
 0xa94   :  { %v1627_v44 = vpop.permute.xlu0 %1626 }
 0xa95   :  { %v1630_v49 = vsel %vm409_vm2, %v1627_v44, %v1629_v43  ;;  %v1633_v52 = vadd.f32 %v1627_v44, %v1607_v48 }
 0xa96   :  { %v1661_v51 = vpop.permute.xlu1 %1660  ;;  %v1634_v0 = vadd.f32 %v1630_v49, %v1608_v50 }
 0xa98   :  { %v1659_v54 = vpop.permute.xlu0 %1658 }
 0xa99   :  { %v1662_v56 = vsel %vm409_vm2, %v1659_v54, %v1661_v51  ;;  %v1665_v57 = vadd.f32 %v1659_v54, %v1633_v52 }
 0xa9a   :  { %v1666_v33 = vadd.f32 %v1662_v56, %v1634_v0  ;;  %v1397_v53 = vpop.permute.xlu1 %1396 }
 0xa9b   :  { %v1667_v30 = vmul.f32 0.5, %v1665_v57  ;;  %1880 = vst.msk [vmem:[%s2964_s29] sm:$0xff] %vm322_vm1, %v1397_v53  ;;  %v1399_v6 = vsub.f32 %v3063_v14, %v1397_v53  ;;  %s2800_s29 = smov 118   ;;  %v1984_v14 = vsel %vm1785_vm11, 1.0, %v2792_v1 }
 0xa9c   :  { %v1668_v60 = vmul.f32 0.5, %v1666_v33  ;;  %v1427_v61 = vpop.permute.xlu0 %1426  ;;  %v1837_v20 = vmul.f32 %v1984_v14, %v3212_v12 }
 0xa9d   :  { %v1429_v62 = vsub.f32 %v1423_v58, %v1427_v61  ;;  %1756 = vrot.lane.b32.xlu0 %v1667_v30, %s2794_s11  ;;  %v1409_v7 = vmul.f32 %v1407_v5, %v1399_v6 }
 0xa9e   :  { %1758 = vrot.lane.b32.xlu1 %v1668_v60, %s2794_s11  ;;  %v1838_v23 = vsel %vm930_vm6, %v1837_v20, 0.0 }
 0xa9f   :  { %v1432_v2 = vsub.f32 %v1429_v62, %v2387_v63  ;;  %v1410_v41 = vmul.f32 0.5, %v1409_v7  ;;  %v1839_v24 = vrot.slane %v1838_v23, 4 }
 0xaa1   :  { %v1433_v3 = vmul.f32 -0.5, %v1432_v2  ;;  %v1411_v8 = vmul.f32 %v1410_v41, %v1409_v7  ;;  %v1840_v25 = vadd.f32 %v1839_v24, %v1838_v23 }
 0xaa3   :  { %1435 = vrot.lane.b32.xlu0 %v1433_v3, %s2793_s22  ;;  %v1418_v10 = vadd.f32 %v1416_v9, %v1411_v8  ;;  %v1841_v26 = vrot.slane %v1840_v25, 2 }
 0xaa5   :  { %v1419_v11 = vadd.f32 0.9189385, %v1418_v10  ;;  %v1842_v27 = vadd.f32 %v1841_v26, %v1840_v25 }
 0xaa7   :  { %v1420_v13 = vsel %vm322_vm1, %v1419_v11, 0.0  ;;  %v1843_v15 = vrot.slane %v1842_v27, 1 }
 0xaa9   :  { %v1844_v28 = vadd.f32 %v1843_v15, %v1842_v27 }
 0xaab   :  { %v1845_v29 = vmul.f32 0.5, %v1844_v28 }
 0xaad   :  { %2390 = vlog2.f32 %v1845_v29 }
 0xab7   :  { %v2391_v34 = vpop.eup %2390 }
 0xab8   :  { %v1847_v38 = vmul.f32 0.6931472, %v2391_v34 }
 0xaba   :  { %v1848_v39 = vadd.f32 2.3025851, %v1847_v38 }
 0xabc   :  { %v1849_v42 = vmul.f32 %v1848_v39, %v1845_v29 }
 0xac2   :  { %1421 = vadd.xlane.f32.xlu1 %v1420_v13 }
 0xac6   :  { %1781 = vmax.xlane.f32.xlu1 %v1780_v16  ;;  %v1854_v16 = vand.u32 127, %v1213_v18 }
 0xac8   :  { %vm1855_vm12 = vcmp.eq.s32.totalorder %v1854_v16, 0  ;;  %vm1857_vm13 = vcmp.eq.s32.totalorder %v1854_v16, 1  ;;  %vm1859_vm14 = vcmp.eq.s32.totalorder %v1854_v16, 2  ;;  %vm1861_vm15 = vcmp.eq.s32.totalorder %v1854_v16, 3 }
 0xac9   :  { %vm1863_vm0 = vcmp.eq.s32.totalorder %v1854_v16, 4  ;;  %vm1865_vm1 = vcmp.eq.s32.totalorder %v1854_v16, 5 }
 0xaca   :  { %1773 = vadd.xlane.f32.xlu1 %v1772_v22 }
 0xadb   :  { %1876 = vrot.lane.b32.xlu1 %v3165_v59, %s2800_s29 }
 0xb0f   :  { %v1757_v31 = vpop.permute.xlu0 %1756 }
 0xb10   :  { %v1759_v32 = vpop.permute.xlu1 %1758 }
 0xb11   :  { %v1760_v59 = vsel %vm1614_vm10, %v1757_v31, %v1759_v32  ;;  %v1764_v19 = vmul.f32 %v1759_v32, %v3257_v47  ;;  %v1850_v47 = vsel %vm930_vm6, %v1849_v42, 0.0 }
 0xb12   :  { %v1763_v1 = vmul.f32 %v1760_v59, %v3255_v46 }
 0xb13   :  { %v1765_v12 = vsel %vm409_vm2, %v1764_v19, 0.0  ;;  %vm1867_vm2 = vcmp.eq.s32.totalorder %v1854_v16, 6 }
 0xb14   :  { %v1766_v35 = vadd.f32 %v1765_v12, %v1763_v1 }
 0xb15   :  { %v1436_v36 = vpop.permute.xlu0 %1435 }
 0xb16   :  { %v1438_v37 = vsel %vm669_vm4, %v1436_v36, 0.0 }
 0xb17   :  { %1439 = vadd.xlane.f32.xlu0 %v1438_v37 }
 0xb1b   :  { %1767 = vadd.xlane.f32.xlu0 %v1766_v35 }
 0xb1f   :  { %1778 = vadd.xlane.f32.xlu0 %v1777_v40 }
 0xb23   :  { %1851 = vadd.xlane.f32.xlu0 %v1850_v47 }
 0xb4f   :  { %v1422_v46 = vpop.xlane.xlu1 %1421 }
 0xb50   :  { %v1788_v48 = vmul.f32 %v1984_v14, %v1422_v46 }
 0xb52   :  { %v1789_v49 = vrot.slane %v1788_v48, 4 }
 0xb53   :  { %v1782_v43 = vpop.xlane.xlu1 %1781 }
 0xb54   :  { %v1820_v50 = vmul.f32 %v1984_v14, %v1782_v43  ;;  %v1790_v51 = vadd.f32 %v1789_v49, %v1788_v48 }
 0xb56   :  { %v1821_v52 = vrot.slane %v1820_v50, 4  ;;  %v1791_v54 = vrot.slane %v1790_v51, 2 }
 0xb57   :  { %v1774_v44 = vpop.xlane.xlu1 %1773 }
 0xb58   :  { %v1829_v0 = vmul.f32 %v1984_v14, %v1774_v44  ;;  %v1822_v55 = vadd.f32 %v1821_v52, %v1820_v50  ;;  %v1792_v33 = vadd.f32 %v1791_v54, %v1790_v51 }
 0xb5a   :  { %v1830_v56 = vrot.slane %v1829_v0, 4  ;;  %v1823_v30 = vrot.slane %v1822_v55, 2  ;;  %v1793_v63 = vrot.slane %v1792_v33, 1 }
 0xb5b   :  { %v1877_v45 = vpop.permute.xlu1 %1876 }
 0xb5c   :  { %1879 = vst.msk [vmem:[%s2959_s9] sm:$0xff] %vm930_vm6, %v1877_v45  ;;  %v1831_v60 = vadd.f32 %v1830_v56, %v1829_v0  ;;  %v1824_v4 = vadd.f32 %v1823_v30, %v1822_v55  ;;  %v1794_v9 = vadd.f32 %v1793_v63, %v1792_v33 }
 0xb5e   :  { %v1832_v6 = vrot.slane %v1831_v60, 2  ;;  %v1825_v21 = vrot.slane %v1824_v4, 1  ;;  %v1795_v25 = vmul.f32 0.5, %v1794_v9 }
 0xb60   :  { %v1833_v22 = vadd.f32 %v1832_v6, %v1831_v60  ;;  %v1826_v15 = vadd.f32 %v1825_v21, %v1824_v4  ;;  %v1856_v19 = vsel %vm1855_vm12, %v1795_v25, 0.0 }
 0xb62   :  { %v1834_v29 = vrot.slane %v1833_v22, 1  ;;  %v1827_v18 = vmul.f32 0.5, %v1826_v15 }
 0xb64   :  { %v1835_v34 = vadd.f32 %v1834_v29, %v1833_v22  ;;  %v1828_v38 = vsub.f32 0.0, %v1827_v18 }
 0xb66   :  { %v1836_v40 = vmul.f32 0.5, %v1835_v34 }
 0xba4   :  { %v1440_v17 = vpop.xlane.xlu0 %1439 }
 0xba5   :  { %v1796_v57 = vmul.f32 %v1984_v14, %v1440_v17 }
 0xba7   :  { %v1797_v53 = vrot.slane %v1796_v57, 4 }
 0xba8   :  { %v1768_v58 = vpop.xlane.xlu0 %1767 }
 0xba9   :  { %v1798_v61 = vadd.f32 %v1797_v53, %v1796_v57  ;;  %v1804_v62 = vmul.f32 %v1984_v14, %v1768_v58 }
 0xbab   :  { %v1799_v2 = vrot.slane %v1798_v61, 2  ;;  %v1805_v3 = vrot.slane %v1804_v62, 4 }
 0xbac   :  { %v1779_v5 = vpop.xlane.xlu0 %1778 }
 0xbad   :  { %v1800_v7 = vadd.f32 %v1799_v2, %v1798_v61  ;;  %v1806_v41 = vadd.f32 %v1805_v3, %v1804_v62  ;;  %v1812_v8 = vmul.f32 %v1984_v14, %v1779_v5 }
 0xbaf   :  { %v1801_v10 = vrot.slane %v1800_v7, 1  ;;  %v1807_v11 = vrot.slane %v1806_v41, 2  ;;  %v1813_v13 = vrot.slane %v1812_v8, 4 }
 0xbb0   :  { %v1852_v37 = vpop.xlane.xlu0 %1851 }
 0xbb1   :  { %v1802_v20 = vadd.f32 %v1801_v10, %v1800_v7  ;;  %v1808_v23 = vadd.f32 %v1807_v11, %v1806_v41  ;;  %v1814_v24 = vadd.f32 %v1813_v13, %v1812_v8 }
 0xbb3   :  { %v1809_v26 = vrot.slane %v1808_v23, 1  ;;  %v1815_v27 = vrot.slane %v1814_v24, 2  ;;  %v1803_v28 = vmul.f32 0.5, %v1802_v20 }
 0xbb5   :  { %v1810_v31 = vadd.f32 %v1809_v26, %v1808_v23  ;;  %v1816_v14 = vadd.f32 %v1815_v27, %v1814_v24  ;;  %v1858_v1 = vsel %vm1857_vm13, %v1803_v28, %v1856_v19 }
 0xbb7   :  { %v1811_v32 = vmul.f32 0.5, %v1810_v31  ;;  %v1817_v59 = vrot.slane %v1816_v14, 1 }
 0xbb9   :  { %v1818_v12 = vadd.f32 %v1817_v59, %v1816_v14  ;;  %v1860_v35 = vsel %vm1859_vm14, %v1811_v32, %v1858_v1 }
 0xbba   :  { %v1862_v39 = vsel %vm1861_vm15, %v1852_v37, %v1860_v35 }
 0xbbb   :  { %v1819_v36 = vmul.f32 0.5, %v1818_v12 }
 0xbbd   :  { %v1864_v42 = vsel %vm1863_vm0, %v1819_v36, %v1862_v39 }
 0xbbe   :  { %v1866_v47 = vsel %vm1865_vm1, %v1828_v38, %v1864_v42 }
 0xbbf   :  { %v1868_v46 = vsel %vm1867_vm2, %v1836_v40, %v1866_v47 }
 0xbc0   :  { %1884 = vst [vmem:[%s2974_s5] sm:$0x1] %v1868_v46 }
 0xbc1   :  { %1917 = vsyncpa [#allocation3], 1 }
 0xbc2   :  { %1918 = vsyncpa [#allocation5], 1 }
 0xbc3   :  { %1919 = vsyncpa [#allocation8], 1 }
 0xbc4   :  { %1920 = vsyncpa [#allocation11], 1 }
 0xbc5   :  { %1921 = vsyncpa [#allocation14], 1 }
 0xbc6   :  { %1922 = vsyncpa [#allocation17], 1 }
 0xbc7   :  { %1923 = vsyncpa [#allocation20], 1 }
 0xbc8   :  { %1924 = vsyncpa [#allocation23], 1 }

</bundles_post_ra>
